<compile_context>
chip_gen: v5e
topology: v5e:2x2
jax: 0.10.0
libtpu: 0.0.40
codegen_flags: <defaults>
</compile_context>

<pallas_src>
import numpy as np

import jax
import jax.numpy as jnp
from jax import lax
from jax.experimental import pallas as pl
from jax.experimental.pallas import tpu as pltpu


N_IMG = 8 * 5 * 5          # 200 real conv features
N_AUX = 9                  # aux features
CONV_PAD = 256             # conv feature lanes padded to a 128-multiple
OUT_PAD = 128              # fc3 output lanes padded to a 128-multiple
N_LOGITS = 2


# ----------------------------------------------------------------------------
# Kernel
# ----------------------------------------------------------------------------

def _ln_rows(x, w, b, eps=1e-5):
    """Row-wise LayerNorm over the last (lane) axis; runs inside the kernel."""
    mean = jnp.mean(x, axis=1, keepdims=True)
    d = x - mean
    var = jnp.mean(d * d, axis=1, keepdims=True)
    return d * lax.rsqrt(var + eps) * w + b


def _classifier_kernel(img_ref, feat_ref,
                       m1_ref, beff1_ref, m2_ref, beff2_ref,
                       lnw_h_ref, lnb_h_ref, lnw_f_ref, lnb_f_ref,
                       w1h_ref, w1f_ref, b1_ref, ln1w_ref, ln1b_ref,
                       w2_ref, b2_ref, ln2w_ref, ln2b_ref,
                       w3_ref, b3_ref,
                       out_ref):
    f32 = jnp.float32
    bf16 = jnp.bfloat16

    img = img_ref[...]          # (B, 100)  NCHW-flattened (4,5,5) image, f32
    feat = feat_ref[...]        # (B, 9), f32

    # pad(-1) + conv1 + ReLU  (pad folded into the effective bias beff1).
    # m1 is (100, 256) bf16 with zero pad columns -> pad lanes of h1 stay 0.
    h1 = jnp.maximum(
        jnp.dot(img.astype(bf16), m1_ref[...], preferred_element_type=f32)
        + beff1_ref[...], 0.0)                                   # (B, 256)

    # conv2 (zero pad folded into m2) + ReLU + residual skip.
    # m2 is (256, 256) bf16 with zero pad rows/cols -> pad lanes of h2 stay 0.
    h2 = jnp.maximum(
        jnp.dot(h1.astype(bf16), m2_ref[...], preferred_element_type=f32)
        + beff2_ref[...], 0.0) + h1                              # (B, 256)

    # LayerNorm over concat([h2[:, :200], feat]) (209 real features) without
    # materializing the concat.  E[x^2]-mean^2 form so the 56 zero pad lanes
    # contribute nothing.
    n_tot = float(N_IMG + N_AUX)                                 # 209
    s1 = (jnp.sum(h2, axis=1, keepdims=True)
          + jnp.sum(feat, axis=1, keepdims=True))
    s2 = (jnp.sum(h2 * h2, axis=1, keepdims=True)
          + jnp.sum(feat * feat, axis=1, keepdims=True))
    mean = s1 / n_tot
    var = jnp.maximum(s2 / n_tot - mean * mean, 0.0)
    inv = lax.rsqrt(var + 1e-5)
    # lnw_h/lnb_h pad lanes are zero -> xh pad lanes stay exactly 0.
    xh = (h2 - mean) * inv * lnw_h_ref[...] + lnb_h_ref[...]     # (B, 256)
    xf = (feat - mean) * inv * lnw_f_ref[...] + lnb_f_ref[...]   # (B, 9)

    # fc1 (split across the two concat halves) + LayerNorm(512) + tanh.
    z1 = (jnp.dot(xh.astype(bf16), w1h_ref[...], preferred_element_type=f32)
          + jnp.dot(xf.astype(bf16), w1f_ref[...], preferred_element_type=f32)
          + b1_ref[...])
    y1 = jnp.tanh(_ln_rows(z1, ln1w_ref[...], ln1b_ref[...]))    # (B, 512)

    # fc2 + LayerNorm(256) + tanh.
    z2 = (jnp.dot(y1.astype(bf16), w2_ref[...], preferred_element_type=f32)
          + b2_ref[...])
    y2 = jnp.tanh(_ln_rows(z2, ln2w_ref[...], ln2b_ref[...]))    # (B, 256)

    # fc3 -> logits, padded to 128 lanes for a lane-dense (unmasked) store.
    out_ref[...] = (jnp.dot(y2.astype(bf16), w3_ref[...],
                            preferred_element_type=f32)
                    + b3_ref[...])                               # (B, 128)


# ----------------------------------------------------------------------------
# One-time parameter transform: 3x3 conv over a 5x5 map -> dense matmul
# ----------------------------------------------------------------------------

def _conv3x3_to_dense(w, b, pad_value, hw=5):
    """Express a padding=1 3x3 conv over an hw x hw map as (in_flat @ M) + beff.

    Flatten order is NCHW (index = c*hw*hw + y*hw + x) on both sides.
    Out-of-bounds taps contribute `pad_value` and are folded into `beff`.
    """
    w = np.asarray(w, np.float32)     # (Cout, Cin, 3, 3)
    b = np.asarray(b, np.float32)     # (Cout,)
    cout, cin, kh, kw = w.shape
    M = np.zeros((cin * hw * hw, cout * hw * hw), np.float32)
    beff = np.repeat(b, hw * hw).astype(np.float32)   # index co*25 + y*5 + x
    for co in range(cout):
        for y in range(hw):
            for x in range(hw):
                o = co * hw * hw + y * hw + x
                for ci in range(cin):
                    for dy in range(kh):
                        for dx in range(kw):
                            iy, ix = y + dy - 1, x + dx - 1
                            if 0 <= iy < hw and 0 <= ix < hw:
                                M[ci * hw * hw + iy * hw + ix, o] += w[co, ci, dy, dx]
                            else:
                                beff[o] += pad_value * w[co, ci, dy, dx]
    return M, beff


def _pad2d(a, rows, cols):
    out = np.zeros((rows, cols), np.float32)
    a = np.asarray(a, np.float32)
    out[:a.shape[0], :a.shape[1]] = a
    return out


def prepare_kernel_params(p):
    """Build kernel-ready, lane-dense, pre-transposed, 128-padded params.

    Matmul weights are stored in bf16 (MXU-native, half the weight DMA);
    biases / LayerNorm affine stay f32.
    """
    bf16 = jnp.bfloat16
    P = CONV_PAD

    m1, beff1 = _conv3x3_to_dense(p['w_conv1'], p['b_conv1'], pad_value=-1.0)
    m2, beff2 = _conv3x3_to_dense(p['w_conv2'], p['b_conv2'], pad_value=0.0)

    ln_w = np.asarray(p['ln_w'], np.float32)
    ln_b = np.asarray(p['ln_b'], np.float32)
    w_fc1 = np.asarray(p['w_fc1'], np.float32)
    w_fc3 = np.asarray(p['w_fc3'], np.float32)

    return dict(
        m1=jnp.asarray(_pad2d(m1, N_IMG // 2, P), bf16),            # (100, 256)
        beff1=jnp.asarray(_pad2d(beff1.reshape(1, -1), 1, P)),      # (1, 256)
        m2=jnp.asarray(_pad2d(m2, P, P), bf16),                     # (256, 256)
        beff2=jnp.asarray(_pad2d(beff2.reshape(1, -1), 1, P)),      # (1, 256)
        lnw_h=jnp.asarray(_pad2d(ln_w[:N_IMG].reshape(1, -1), 1, P)),
        lnb_h=jnp.asarray(_pad2d(ln_b[:N_IMG].reshape(1, -1), 1, P)),
        lnw_f=jnp.asarray(ln_w[N_IMG:].reshape(1, -1)),
        lnb_f=jnp.asarray(ln_b[N_IMG:].reshape(1, -1)),
        w1h=jnp.asarray(_pad2d(w_fc1[:, :N_IMG].T, P, 512), bf16),  # (256, 512)
        w1f=jnp.asarray(w_fc1[:, N_IMG:].T, bf16),                  # (9, 512)
        b1=jnp.asarray(p['b_fc1'], jnp.float32).reshape(1, -1),
        ln1w=jnp.asarray(p['ln1_w'], jnp.float32).reshape(1, -1),
        ln1b=jnp.asarray(p['ln1_b'], jnp.float32).reshape(1, -1),
        w2=jnp.transpose(jnp.asarray(p['w_fc2'], jnp.float32)).astype(bf16),
        b2=jnp.asarray(p['b_fc2'], jnp.float32).reshape(1, -1),
        ln2w=jnp.asarray(p['ln2_w'], jnp.float32).reshape(1, -1),
        ln2b=jnp.asarray(p['ln2_b'], jnp.float32).reshape(1, -1),
        w3=jnp.asarray(_pad2d(w_fc3.T, 256, OUT_PAD), bf16),        # (256, 128)
        b3=jnp.asarray(_pad2d(np.asarray(p['b_fc3'], np.float32).reshape(1, -1),
                              1, OUT_PAD)),                         # (1, 128)
    )


# ----------------------------------------------------------------------------
# Wrapper
# ----------------------------------------------------------------------------

def gamma_proton_forward(image, features, kp, *, batch_block=None,
                         vmem_limit_bytes=None):
    """Forward pass of GammaProtonClassifier10 via a single Pallas kernel.

    image: (B, 4, 5, 5) float, features: (B, 9) float -> (B, 2) logits.

    batch_block=None  -> one gridless call (best for small B on v5e/v6e).
    batch_block=tb    -> 1-D "parallel" grid over the batch.  Use a large tb
      (multiple of 8; 256-1024 is a good range, >=128 on v5e / >=256 on
      v6e-v7x to fill the MXU rows).  On v7x (2 TensorCores) prefer this path
      with >=2 grid steps so both cores are used.
    vmem_limit_bytes  -> raise the scoped-VMEM limit for very large blocks
      (v5e default is 16 MiB).
    """
    B = image.shape[0]
    img_flat = image.reshape(B, -1).astype(jnp.float32)   # (B, 100), NCHW order
    feat = features.astype(jnp.float32)                   # (B, 9)
    weights = (kp['m1'], kp['beff1'], kp['m2'], kp['beff2'],
               kp['lnw_h'], kp['lnb_h'], kp['lnw_f'], kp['lnb_f'],
               kp['w1h'], kp['w1f'], kp['b1'], kp['ln1w'], kp['ln1b'],
               kp['w2'], kp['b2'], kp['ln2w'], kp['ln2b'],
               kp['w3'], kp['b3'])
    out_shape = jax.ShapeDtypeStruct((B, OUT_PAD), jnp.float32)

    cp_kwargs = {}
    if vmem_limit_bytes is not None:
        cp_kwargs["vmem_limit_bytes"] = int(vmem_limit_bytes)

    if batch_block is None or batch_block >= B:
        # Small batch: everything fits in VMEM; no grid -> no pipeline overhead.
        cp = pltpu.CompilerParams(**cp_kwargs) if cp_kwargs else None
        out = pl.pallas_call(_classifier_kernel, out_shape=out_shape,
                             compiler_params=cp)(img_flat, feat, *weights)
        return out[:, :N_LOGITS]

    tb = int(batch_block)
    assert B % tb == 0 and tb % 8 == 0, "batch_block must divide B and be %8==0"
    batch_spec = lambda a: pl.BlockSpec((tb, a.shape[1]), lambda i: (i, 0))
    const_spec = lambda a: pl.BlockSpec(a.shape, lambda i: (0, 0))
    in_specs = ([batch_spec(img_flat), batch_spec(feat)]
                + [const_spec(w) for w in weights])
    out = pl.pallas_call(
        _classifier_kernel,
        out_shape=out_shape,
        grid=(B // tb,),
        in_specs=in_specs,
        out_specs=pl.BlockSpec((tb, OUT_PAD), lambda i: (i, 0)),
        compiler_params=pltpu.CompilerParams(
            dimension_semantics=("parallel",), **cp_kwargs),
    )(img_flat, feat, *weights)
    return out[:, :N_LOGITS]


# ----------------------------------------------------------------------------
# Parameter init + pure-JAX reference (mirrors the PyTorch module exactly)
# ----------------------------------------------------------------------------

def init_params(key):
    ks = jax.random.split(key, 16)

    def uni(k, shape, fan_in):
        bound = 1.0 / float(np.sqrt(fan_in))
        return jax.random.uniform(k, shape, jnp.float32, -bound, bound)

    D = N_IMG + N_AUX  # 209
    return {
        'w_conv1': uni(ks[0], (8, 4, 3, 3), 4 * 9),
        'b_conv1': uni(ks[1], (8,), 4 * 9),
        'w_conv2': uni(ks[2], (8, 8, 3, 3), 8 * 9),
        'b_conv2': uni(ks[3], (8,), 8 * 9),
        'ln_w': 1.0 + 0.1 * jax.random.normal(ks[4], (D,), jnp.float32),
        'ln_b': 0.05 * jax.random.normal(ks[5], (D,), jnp.float32),
        'w_fc1': uni(ks[6], (512, D), D),
        'b_fc1': uni(ks[7], (512,), D),
        'ln1_w': 1.0 + 0.1 * jax.random.normal(ks[8], (512,), jnp.float32),
        'ln1_b': 0.05 * jax.random.normal(ks[9], (512,), jnp.float32),
        'w_fc2': uni(ks[10], (256, 512), 512),
        'b_fc2': uni(ks[11], (256,), 512),
        'ln2_w': 1.0 + 0.1 * jax.random.normal(ks[12], (256,), jnp.float32),
        'ln2_b': 0.05 * jax.random.normal(ks[13], (256,), jnp.float32),
        'w_fc3': uni(ks[14], (2, 256), 256),
        'b_fc3': uni(ks[15], (2,), 256),
    }


def _ref_layernorm(x, w, b, eps=1e-5):
    mean = jnp.mean(x, axis=-1, keepdims=True)
    var = jnp.mean((x - mean) ** 2, axis=-1, keepdims=True)
    return (x - mean) / jnp.sqrt(var + eps) * w + b


def _ref_forward(image, features, p):
    hi = lax.Precision.HIGHEST
    dn = ('NCHW', 'OIHW', 'NCHW')
    x = jnp.pad(image, ((0, 0), (0, 0), (1, 1), (1, 1)), constant_values=-1.0)
    x = lax.conv_general_dilated(x, p['w_conv1'], (1, 1), 'VALID',
                                 dimension_numbers=dn, precision=hi)
    x = jnp.maximum(x + p['b_conv1'][None, :, None, None], 0.0)
    ident = x
    x = lax.conv_general_dilated(x, p['w_conv2'], (1, 1), ((1, 1), (1, 1)),
                                 dimension_numbers=dn, precision=hi)
    x = jnp.maximum(x + p['b_conv2'][None, :, None, None], 0.0) + ident
    x = x.reshape(x.shape[0], -1)
    x = jnp.concatenate([x, features], axis=1)
    x = _ref_layernorm(x, p['ln_w'], p['ln_b'])
    x = jnp.tanh(_ref_layernorm(
        jnp.dot(x, p['w_fc1'].T, precision=hi) + p['b_fc1'],
        p['ln1_w'], p['ln1_b']))
    x = jnp.tanh(_ref_layernorm(
        jnp.dot(x, p['w_fc2'].T, precision=hi) + p['b_fc2'],
        p['ln2_w'], p['ln2_b']))
    return jnp.dot(x, p['w_fc3'].T, precision=hi) + p['b_fc3']


# ----------------------------------------------------------------------------
# Demo / verification
# ----------------------------------------------------------------------------

if __name__ == "__main__":
    key = jax.random.PRNGKey(0)
    k_img, k_feat, k_par, k_img2, k_feat2 = jax.random.split(key, 5)

    params = init_params(k_par)
    kparams = prepare_kernel_params(params)

    # bf16 MXU operands with f32 accumulation vs an f32-HIGHEST reference:
    # expect ~1e-2-level worst-case error through the LayerNorm stack.
    RTOL = ATOL = 2e-2

    # Small batch: single gridless fused kernel.
    B = 8
    image = jax.random.normal(k_img, (B, 4, 5, 5), dtype=jnp.float32)
    features = jax.random.normal(k_feat, (B, 9), dtype=jnp.float32)

    out = jax.block_until_ready(gamma_proton_forward(image, features, kparams))
    ref = _ref_forward(image, features, params)
    assert out.shape == (B, 2)
    assert jnp.allclose(out, ref, rtol=RTOL, atol=ATOL), (
        float(jnp.max(jnp.abs(out - ref))))

    # Larger batch: 2-step "parallel" grid over B with a 128-row block
    # (fills the MXU rows; >=2 steps keeps both TensorCores busy on v7x).
    B2, TB = 256, 128
    image2 = jax.random.normal(k_img2, (B2, 4, 5, 5), dtype=jnp.float32)
    features2 = jax.random.normal(k_feat2, (B2, 9), dtype=jnp.float32)

    out2 = jax.block_until_ready(
        gamma_proton_forward(image2, features2, kparams, batch_block=TB))
    ref2 = _ref_forward(image2, features2, params)
    assert out2.shape == (B2, 2)
    assert jnp.allclose(out2, ref2, rtol=RTOL, atol=ATOL), (
        float(jnp.max(jnp.abs(out2 - ref2))))

    print("KERNEL_OK")
</pallas_src>

<mosaic_0001>
module attributes {stable_mosaic.version = 11 : i64} {
  func.func @_classifier_kernel(%arg0: memref<8x100xf32, #tpu.memory_space<vmem>>, %arg1: memref<8x9xf32, #tpu.memory_space<vmem>>, %arg2: memref<100x256xbf16, #tpu.memory_space<vmem>>, %arg3: memref<1x256xf32, #tpu.memory_space<vmem>>, %arg4: memref<256x256xbf16, #tpu.memory_space<vmem>>, %arg5: memref<1x256xf32, #tpu.memory_space<vmem>>, %arg6: memref<1x256xf32, #tpu.memory_space<vmem>>, %arg7: memref<1x256xf32, #tpu.memory_space<vmem>>, %arg8: memref<1x9xf32, #tpu.memory_space<vmem>>, %arg9: memref<1x9xf32, #tpu.memory_space<vmem>>, %arg10: memref<256x512xbf16, #tpu.memory_space<vmem>>, %arg11: memref<9x512xbf16, #tpu.memory_space<vmem>>, %arg12: memref<1x512xf32, #tpu.memory_space<vmem>>, %arg13: memref<1x512xf32, #tpu.memory_space<vmem>>, %arg14: memref<1x512xf32, #tpu.memory_space<vmem>>, %arg15: memref<512x256xbf16, #tpu.memory_space<vmem>>, %arg16: memref<1x256xf32, #tpu.memory_space<vmem>>, %arg17: memref<1x256xf32, #tpu.memory_space<vmem>>, %arg18: memref<1x256xf32, #tpu.memory_space<vmem>>, %arg19: memref<256x128xbf16, #tpu.memory_space<vmem>>, %arg20: memref<1x128xf32, #tpu.memory_space<vmem>>, %arg21: memref<8x128xf32, #tpu.memory_space<vmem>>) attributes {dimension_semantics = [], scalar_prefetch = 0 : i64, scratch_operands = 0 : i64, tpu.core_type = #tpu.core_type<tc>} {
    %c0 = arith.constant 0 : index
    %c0_0 = arith.constant 0 : index
    %0 = vector.load %arg0[%c0, %c0_0] : memref<8x100xf32, #tpu.memory_space<vmem>>, vector<8x100xf32>
    %c0_1 = arith.constant 0 : index
    %c0_2 = arith.constant 0 : index
    %1 = vector.load %arg1[%c0_1, %c0_2] : memref<8x9xf32, #tpu.memory_space<vmem>>, vector<8x9xf32>
    %2 = arith.truncf %0 : vector<8x100xf32> to vector<8x100xbf16>
    %c0_3 = arith.constant 0 : index
    %c0_4 = arith.constant 0 : index
    %3 = vector.load %arg2[%c0_3, %c0_4] : memref<100x256xbf16, #tpu.memory_space<vmem>>, vector<100x256xbf16>
    %cst = arith.constant dense<0.000000e+00> : vector<8x256xf32>
    %4 = tpu.matmul %2, %3, %cst {dimension_numbers = #tpu.dot_dimension_numbers<[1], [0], [0], [1], [0, 0, 1, 1], [], []>} : vector<8x100xbf16>, vector<100x256xbf16>, vector<8x256xf32> -> vector<8x256xf32>
    %c0_5 = arith.constant 0 : index
    %c0_6 = arith.constant 0 : index
    %5 = vector.load %arg3[%c0_5, %c0_6] : memref<1x256xf32, #tpu.memory_space<vmem>>, vector<1x256xf32>
    %6 = vector.broadcast %5 : vector<1x256xf32> to vector<8x256xf32>
    %7 = arith.addf %4, %6 : vector<8x256xf32>
    %cst_7 = arith.constant 0.000000e+00 : f32
    %8 = vector.broadcast %cst_7 : f32 to vector<8x256xf32>
    %9 = arith.maximumf %7, %8 : vector<8x256xf32>
    %10 = arith.truncf %9 : vector<8x256xf32> to vector<8x256xbf16>
    %c0_8 = arith.constant 0 : index
    %c0_9 = arith.constant 0 : index
    %11 = vector.load %arg4[%c0_8, %c0_9] : memref<256x256xbf16, #tpu.memory_space<vmem>>, vector<256x256xbf16>
    %cst_10 = arith.constant dense<0.000000e+00> : vector<8x256xf32>
    %12 = tpu.matmul %10, %11, %cst_10 {dimension_numbers = #tpu.dot_dimension_numbers<[1], [0], [0], [1], [0, 0, 1, 1], [], []>} : vector<8x256xbf16>, vector<256x256xbf16>, vector<8x256xf32> -> vector<8x256xf32>
    %c0_11 = arith.constant 0 : index
    %c0_12 = arith.constant 0 : index
    %13 = vector.load %arg5[%c0_11, %c0_12] : memref<1x256xf32, #tpu.memory_space<vmem>>, vector<1x256xf32>
    %14 = vector.broadcast %13 : vector<1x256xf32> to vector<8x256xf32>
    %15 = arith.addf %12, %14 : vector<8x256xf32>
    %cst_13 = arith.constant 0.000000e+00 : f32
    %16 = vector.broadcast %cst_13 : f32 to vector<8x256xf32>
    %17 = arith.maximumf %15, %16 : vector<8x256xf32>
    %18 = arith.addf %17, %9 : vector<8x256xf32>
    %cst_14 = arith.constant dense<0.000000e+00> : vector<8xf32>
    %19 = vector.multi_reduction <add>, %18, %cst_14 [1] : vector<8x256xf32> to vector<8xf32>
    %20 = vector.shape_cast %19 : vector<8xf32> to vector<8x1xf32>
    %cst_15 = arith.constant dense<0.000000e+00> : vector<8xf32>
    %21 = vector.multi_reduction <add>, %1, %cst_15 [1] : vector<8x9xf32> to vector<8xf32>
    %22 = vector.shape_cast %21 : vector<8xf32> to vector<8x1xf32>
    %23 = arith.addf %20, %22 : vector<8x1xf32>
    %24 = arith.mulf %18, %18 : vector<8x256xf32>
    %cst_16 = arith.constant dense<0.000000e+00> : vector<8xf32>
    %25 = vector.multi_reduction <add>, %24, %cst_16 [1] : vector<8x256xf32> to vector<8xf32>
    %26 = vector.shape_cast %25 : vector<8xf32> to vector<8x1xf32>
    %27 = arith.mulf %1, %1 : vector<8x9xf32>
    %cst_17 = arith.constant dense<0.000000e+00> : vector<8xf32>
    %28 = vector.multi_reduction <add>, %27, %cst_17 [1] : vector<8x9xf32> to vector<8xf32>
    %29 = vector.shape_cast %28 : vector<8xf32> to vector<8x1xf32>
    %30 = arith.addf %26, %29 : vector<8x1xf32>
    %cst_18 = arith.constant 2.090000e+02 : f32
    %31 = vector.broadcast %cst_18 : f32 to vector<8x1xf32>
    %32 = arith.divf %23, %31 : vector<8x1xf32>
    %cst_19 = arith.constant 2.090000e+02 : f32
    %33 = vector.broadcast %cst_19 : f32 to vector<8x1xf32>
    %34 = arith.divf %30, %33 : vector<8x1xf32>
    %35 = arith.mulf %32, %32 : vector<8x1xf32>
    %36 = arith.subf %34, %35 : vector<8x1xf32>
    %cst_20 = arith.constant 0.000000e+00 : f32
    %37 = vector.broadcast %cst_20 : f32 to vector<8x1xf32>
    %38 = arith.maximumf %36, %37 : vector<8x1xf32>
    %cst_21 = arith.constant 9.99999974E-6 : f32
    %39 = vector.broadcast %cst_21 : f32 to vector<8x1xf32>
    %40 = arith.addf %38, %39 : vector<8x1xf32>
    %41 = math.rsqrt %40 : vector<8x1xf32>
    %42 = vector.broadcast %32 : vector<8x1xf32> to vector<8x256xf32>
    %43 = arith.subf %18, %42 : vector<8x256xf32>
    %44 = vector.broadcast %41 : vector<8x1xf32> to vector<8x256xf32>
    %45 = arith.mulf %43, %44 : vector<8x256xf32>
    %c0_22 = arith.constant 0 : index
    %c0_23 = arith.constant 0 : index
    %46 = vector.load %arg6[%c0_22, %c0_23] : memref<1x256xf32, #tpu.memory_space<vmem>>, vector<1x256xf32>
    %47 = vector.broadcast %46 : vector<1x256xf32> to vector<8x256xf32>
    %48 = arith.mulf %45, %47 : vector<8x256xf32>
    %c0_24 = arith.constant 0 : index
    %c0_25 = arith.constant 0 : index
    %49 = vector.load %arg7[%c0_24, %c0_25] : memref<1x256xf32, #tpu.memory_space<vmem>>, vector<1x256xf32>
    %50 = vector.broadcast %49 : vector<1x256xf32> to vector<8x256xf32>
    %51 = arith.addf %48, %50 : vector<8x256xf32>
    %52 = vector.broadcast %32 : vector<8x1xf32> to vector<8x9xf32>
    %53 = arith.subf %1, %52 : vector<8x9xf32>
    %54 = vector.broadcast %41 : vector<8x1xf32> to vector<8x9xf32>
    %55 = arith.mulf %53, %54 : vector<8x9xf32>
    %c0_26 = arith.constant 0 : index
    %c0_27 = arith.constant 0 : index
    %56 = vector.load %arg8[%c0_26, %c0_27] : memref<1x9xf32, #tpu.memory_space<vmem>>, vector<1x9xf32>
    %57 = vector.broadcast %56 : vector<1x9xf32> to vector<8x9xf32>
    %58 = arith.mulf %55, %57 : vector<8x9xf32>
    %c0_28 = arith.constant 0 : index
    %c0_29 = arith.constant 0 : index
    %59 = vector.load %arg9[%c0_28, %c0_29] : memref<1x9xf32, #tpu.memory_space<vmem>>, vector<1x9xf32>
    %60 = vector.broadcast %59 : vector<1x9xf32> to vector<8x9xf32>
    %61 = arith.addf %58, %60 : vector<8x9xf32>
    %62 = arith.truncf %51 : vector<8x256xf32> to vector<8x256xbf16>
    %c0_30 = arith.constant 0 : index
    %c0_31 = arith.constant 0 : index
    %63 = vector.load %arg10[%c0_30, %c0_31] : memref<256x512xbf16, #tpu.memory_space<vmem>>, vector<256x512xbf16>
    %cst_32 = arith.constant dense<0.000000e+00> : vector<8x512xf32>
    %64 = tpu.matmul %62, %63, %cst_32 {dimension_numbers = #tpu.dot_dimension_numbers<[1], [0], [0], [1], [0, 0, 1, 1], [], []>} : vector<8x256xbf16>, vector<256x512xbf16>, vector<8x512xf32> -> vector<8x512xf32>
    %65 = arith.truncf %61 : vector<8x9xf32> to vector<8x9xbf16>
    %c0_33 = arith.constant 0 : index
    %c0_34 = arith.constant 0 : index
    %66 = vector.load %arg11[%c0_33, %c0_34] : memref<9x512xbf16, #tpu.memory_space<vmem>>, vector<9x512xbf16>
    %cst_35 = arith.constant dense<0.000000e+00> : vector<8x512xf32>
    %67 = tpu.matmul %65, %66, %cst_35 {dimension_numbers = #tpu.dot_dimension_numbers<[1], [0], [0], [1], [0, 0, 1, 1], [], []>} : vector<8x9xbf16>, vector<9x512xbf16>, vector<8x512xf32> -> vector<8x512xf32>
    %68 = arith.addf %64, %67 : vector<8x512xf32>
    %c0_36 = arith.constant 0 : index
    %c0_37 = arith.constant 0 : index
    %69 = vector.load %arg12[%c0_36, %c0_37] : memref<1x512xf32, #tpu.memory_space<vmem>>, vector<1x512xf32>
    %70 = vector.broadcast %69 : vector<1x512xf32> to vector<8x512xf32>
    %71 = arith.addf %68, %70 : vector<8x512xf32>
    %c0_38 = arith.constant 0 : index
    %c0_39 = arith.constant 0 : index
    %72 = vector.load %arg13[%c0_38, %c0_39] : memref<1x512xf32, #tpu.memory_space<vmem>>, vector<1x512xf32>
    %c0_40 = arith.constant 0 : index
    %c0_41 = arith.constant 0 : index
    %73 = vector.load %arg14[%c0_40, %c0_41] : memref<1x512xf32, #tpu.memory_space<vmem>>, vector<1x512xf32>
    %cst_42 = arith.constant dense<0.000000e+00> : vector<8xf32>
    %74 = vector.multi_reduction <add>, %71, %cst_42 [1] : vector<8x512xf32> to vector<8xf32>
    %75 = vector.shape_cast %74 : vector<8xf32> to vector<8x1xf32>
    %cst_43 = arith.constant 5.120000e+02 : f32
    %76 = vector.broadcast %cst_43 : f32 to vector<8x1xf32>
    %77 = arith.divf %75, %76 : vector<8x1xf32>
    %78 = vector.broadcast %77 : vector<8x1xf32> to vector<8x512xf32>
    %79 = arith.subf %71, %78 : vector<8x512xf32>
    %80 = arith.mulf %79, %79 : vector<8x512xf32>
    %cst_44 = arith.constant dense<0.000000e+00> : vector<8xf32>
    %81 = vector.multi_reduction <add>, %80, %cst_44 [1] : vector<8x512xf32> to vector<8xf32>
    %82 = vector.shape_cast %81 : vector<8xf32> to vector<8x1xf32>
    %cst_45 = arith.constant 5.120000e+02 : f32
    %83 = vector.broadcast %cst_45 : f32 to vector<8x1xf32>
    %84 = arith.divf %82, %83 : vector<8x1xf32>
    %cst_46 = arith.constant 9.99999974E-6 : f32
    %85 = vector.broadcast %cst_46 : f32 to vector<8x1xf32>
    %86 = arith.addf %84, %85 : vector<8x1xf32>
    %87 = math.rsqrt %86 : vector<8x1xf32>
    %88 = vector.broadcast %87 : vector<8x1xf32> to vector<8x512xf32>
    %89 = arith.mulf %79, %88 : vector<8x512xf32>
    %90 = vector.broadcast %72 : vector<1x512xf32> to vector<8x512xf32>
    %91 = arith.mulf %89, %90 : vector<8x512xf32>
    %92 = vector.broadcast %73 : vector<1x512xf32> to vector<8x512xf32>
    %93 = arith.addf %91, %92 : vector<8x512xf32>
    %94 = math.tanh %93 : vector<8x512xf32>
    %95 = arith.truncf %94 : vector<8x512xf32> to vector<8x512xbf16>
    %c0_47 = arith.constant 0 : index
    %c0_48 = arith.constant 0 : index
    %96 = vector.load %arg15[%c0_47, %c0_48] : memref<512x256xbf16, #tpu.memory_space<vmem>>, vector<512x256xbf16>
    %cst_49 = arith.constant dense<0.000000e+00> : vector<8x256xf32>
    %97 = tpu.matmul %95, %96, %cst_49 {dimension_numbers = #tpu.dot_dimension_numbers<[1], [0], [0], [1], [0, 0, 1, 1], [], []>} : vector<8x512xbf16>, vector<512x256xbf16>, vector<8x256xf32> -> vector<8x256xf32>
    %c0_50 = arith.constant 0 : index
    %c0_51 = arith.constant 0 : index
    %98 = vector.load %arg16[%c0_50, %c0_51] : memref<1x256xf32, #tpu.memory_space<vmem>>, vector<1x256xf32>
    %99 = vector.broadcast %98 : vector<1x256xf32> to vector<8x256xf32>
    %100 = arith.addf %97, %99 : vector<8x256xf32>
    %c0_52 = arith.constant 0 : index
    %c0_53 = arith.constant 0 : index
    %101 = vector.load %arg17[%c0_52, %c0_53] : memref<1x256xf32, #tpu.memory_space<vmem>>, vector<1x256xf32>
    %c0_54 = arith.constant 0 : index
    %c0_55 = arith.constant 0 : index
    %102 = vector.load %arg18[%c0_54, %c0_55] : memref<1x256xf32, #tpu.memory_space<vmem>>, vector<1x256xf32>
    %cst_56 = arith.constant dense<0.000000e+00> : vector<8xf32>
    %103 = vector.multi_reduction <add>, %100, %cst_56 [1] : vector<8x256xf32> to vector<8xf32>
    %104 = vector.shape_cast %103 : vector<8xf32> to vector<8x1xf32>
    %cst_57 = arith.constant 2.560000e+02 : f32
    %105 = vector.broadcast %cst_57 : f32 to vector<8x1xf32>
    %106 = arith.divf %104, %105 : vector<8x1xf32>
    %107 = vector.broadcast %106 : vector<8x1xf32> to vector<8x256xf32>
    %108 = arith.subf %100, %107 : vector<8x256xf32>
    %109 = arith.mulf %108, %108 : vector<8x256xf32>
    %cst_58 = arith.constant dense<0.000000e+00> : vector<8xf32>
    %110 = vector.multi_reduction <add>, %109, %cst_58 [1] : vector<8x256xf32> to vector<8xf32>
    %111 = vector.shape_cast %110 : vector<8xf32> to vector<8x1xf32>
    %cst_59 = arith.constant 2.560000e+02 : f32
    %112 = vector.broadcast %cst_59 : f32 to vector<8x1xf32>
    %113 = arith.divf %111, %112 : vector<8x1xf32>
    %cst_60 = arith.constant 9.99999974E-6 : f32
    %114 = vector.broadcast %cst_60 : f32 to vector<8x1xf32>
    %115 = arith.addf %113, %114 : vector<8x1xf32>
    %116 = math.rsqrt %115 : vector<8x1xf32>
    %117 = vector.broadcast %116 : vector<8x1xf32> to vector<8x256xf32>
    %118 = arith.mulf %108, %117 : vector<8x256xf32>
    %119 = vector.broadcast %101 : vector<1x256xf32> to vector<8x256xf32>
    %120 = arith.mulf %118, %119 : vector<8x256xf32>
    %121 = vector.broadcast %102 : vector<1x256xf32> to vector<8x256xf32>
    %122 = arith.addf %120, %121 : vector<8x256xf32>
    %123 = math.tanh %122 : vector<8x256xf32>
    %124 = arith.truncf %123 : vector<8x256xf32> to vector<8x256xbf16>
    %c0_61 = arith.constant 0 : index
    %c0_62 = arith.constant 0 : index
    %125 = vector.load %arg19[%c0_61, %c0_62] : memref<256x128xbf16, #tpu.memory_space<vmem>>, vector<256x128xbf16>
    %cst_63 = arith.constant dense<0.000000e+00> : vector<8x128xf32>
    %126 = tpu.matmul %124, %125, %cst_63 {dimension_numbers = #tpu.dot_dimension_numbers<[1], [0], [0], [1], [0, 0, 1, 1], [], []>} : vector<8x256xbf16>, vector<256x128xbf16>, vector<8x128xf32> -> vector<8x128xf32>
    %c0_64 = arith.constant 0 : index
    %c0_65 = arith.constant 0 : index
    %127 = vector.load %arg20[%c0_64, %c0_65] : memref<1x128xf32, #tpu.memory_space<vmem>>, vector<1x128xf32>
    %128 = vector.broadcast %127 : vector<1x128xf32> to vector<8x128xf32>
    %129 = arith.addf %126, %128 : vector<8x128xf32>
    %c0_66 = arith.constant 0 : index
    %c0_67 = arith.constant 0 : index
    %130 = vector.load %arg21[%c0_66, %c0_67] : memref<8x128xf32, #tpu.memory_space<vmem>>, vector<8x128xf32>
    tpu.vector_store %arg21[%c0_66, %c0_67], %129 {strides = array<i32>} : memref<8x128xf32, #tpu.memory_space<vmem>>, vector<8x128xf32>,
    return
  }
}

</mosaic_0001>

<bundles_post_ra>
// kernel: tpu_custom_call.1
= control target key start
LH: loop header
LB: loop body
LE: loop exit
PB: predicated region body
PF: predicated region fallthrough
CT: control target
= control target key end

     0   :  { %s3854_s0 = inlined_call_operand.hbm [shape: f32[8,100], index: 0, kind: input, shape index: {}]   ;;  %s3855_s1 = inlined_call_operand.hbm [shape: f32[8,9], index: 1, kind: input, shape index: {}]   ;;  %s3856_s2 = inlined_call_operand.hbm [shape: bf16[100,256], index: 2, kind: input, shape index: {}]   ;;  %s3857_s3 = inlined_call_operand.hbm [shape: f32[1,256], index: 3, kind: input, shape index: {}]   ;;  %s3858_s4 = inlined_call_operand.hbm [shape: bf16[256,256], index: 4, kind: input, shape index: {}]   ;;  %s3859_s5 = inlined_call_operand.hbm [shape: f32[1,256], index: 5, kind: input, shape index: {}]   ;;  %s3860_s6 = inlined_call_operand.hbm [shape: f32[1,256], index: 6, kind: input, shape index: {}]   ;;  %s3861_s7 = inlined_call_operand.hbm [shape: f32[1,256], index: 7, kind: input, shape index: {}]   ;;  %s3862_s8 = inlined_call_operand.hbm [shape: f32[1,9], index: 8, kind: input, shape index: {}]   ;;  %s3863_s9 = inlined_call_operand.hbm [shape: f32[1,9], index: 9, kind: input, shape index: {}]   ;;  %s3864_s10 = inlined_call_operand.hbm [shape: bf16[256,512], index: 10, kind: input, shape index: {}]   ;;  %s3865_s11 = inlined_call_operand.hbm [shape: bf16[9,512], index: 11, kind: input, shape index: {}]   ;;  %s3866_s12 = inlined_call_operand.vmem [shape: f32[1,512], index: 12, kind: input, shape index: {}]   ;;  %s3867_s13 = inlined_call_operand.vmem [shape: f32[1,512], index: 13, kind: input, shape index: {}]   ;;  %s3868_s14 = inlined_call_operand.vmem [shape: f32[1,512], index: 14, kind: input, shape index: {}]   ;;  %s3869_s15 = inlined_call_operand.hbm [shape: bf16[512,256], index: 15, kind: input, shape index: {}]   ;;  %s3870_s16 = inlined_call_operand.vmem [shape: f32[1,256], index: 16, kind: input, shape index: {}]   ;;  %s3871_s17 = inlined_call_operand.vmem [shape: f32[1,256], index: 17, kind: input, shape index: {}]   ;;  %s3872_s18 = inlined_call_operand.hbm [shape: f32[1,256], index: 18, kind: input, shape index: {}]   ;;  %s3873_s19 = inlined_call_operand.hbm [shape: bf16[256,128], index: 19, kind: input, shape index: {}]   ;;  %s3874_s20 = inlined_call_operand.vmem [shape: f32[1,128], index: 20, kind: input, shape index: {}]   ;;  %s3875_s21 = inlined_call_operand.hbm [shape: f32[8,128], index: 21, kind: output, shape index: {}]  }
   0x1   :  { %3876 = sst [smem:[#allocation36_spill]] %s3854_s0 }
   0x2   :  { %3877 = sst [smem:[#allocation37_spill]] %s3855_s1 }
   0x3   :  { %3878 = sst [smem:[#allocation38_spill]] %s3856_s2 }
   0x4   :  { %3879 = sst [smem:[#allocation39_spill]] %s3857_s3 }
   0x5   :  { %3880 = sst [smem:[#allocation40_spill]] %s3858_s4 }
   0x6   :  { %3881 = sst [smem:[#allocation41_spill]] %s3859_s5 }
   0x7   :  { %3882 = sst [smem:[#allocation42_spill]] %s3874_s20 }
   0x8   :  { %3883 = sst [smem:[#allocation43_spill]] %s3875_s21 }
   0x9   :  { %26 = vsyncpa [#allocation3], 0 }
   0xa   :  { %27 = vsyncpa [#allocation6], 0 }
   0xb   :  { %28 = vsyncpa [#allocation9], 0 }
   0xc   :  { %29 = vsyncpa [#allocation12], 0 }
   0xd   :  { %30 = vsyncpa [#allocation15], 0 }
   0xe   :  { %31 = vsyncpa [#allocation18], 0 }
   0xf   :  { %32 = vsyncpa [#allocation21], 0 }
  0x10   :  { %33 = vsyncpa [#allocation24], 0  ;;  %s3884_s26 = sld [smem:[#allocation37_spill]] }
  0x16   :  { %s51_s27 = sshll.u32 %s3884_s26, 4  ;;  %s52_s27 = int_to_ptr.hbm [resolvable:$true] %s51_s27 }
  0x17   :  { %34 = vsyncpa [#allocation4], 0  ;;  %s3564_s3 = smov [#allocation5]   ;;  %s3885_s4 = sld [smem:[#allocation39_spill]] }
  0x18   :  { %s53_s28 = sshll.u32 %s3564_s3, 4  ;;  %s3565_s5 = smov [#allocation8]   ;;  %s54_s28 = int_to_ptr.vmem [resolvable:$true] %s53_s28 }
  0x19   :  { %56 = dma.hbm_to_vmem [thread:$0]  %s52_s27, 128, %s54_s28, [#allocation6]  }
  0x1a   :  { %s77_s22 = sshll.u32 %s3565_s5, 4  ;;  %s3886_s24 = sld [smem:[#allocation41_spill]]  ;;  %s78_s22 = int_to_ptr.vmem [resolvable:$true] %s77_s22 }
  0x1b   :  { %s121_s26 = sshll.u32 %s3861_s7, 4  ;;  %s3566_s3 = smov [#allocation11]   ;;  %s122_s26 = int_to_ptr.hbm [resolvable:$true] %s121_s26 }
  0x1c   :  { %s101_s20 = sshll.u32 %s3566_s3, 4  ;;  %s3567_s27 = smov [#allocation14]   ;;  %s102_s20 = int_to_ptr.vmem [resolvable:$true] %s101_s20 }
  0x1d   :  { %s75_s30 = sshll.u32 %s3885_s4, 4  ;;  %s123_s28 = sshll.u32 %s3567_s27, 4  ;;  %s76_s30 = int_to_ptr.hbm [resolvable:$true] %s75_s30  ;;  %s124_s28 = int_to_ptr.vmem [resolvable:$true] %s123_s28 }
  0x1e   :  { %80 = dma.hbm_to_vmem [thread:$0]  %s76_s30, 32, %s78_s22, [#allocation9]  }
  0x1f   :  { %s143_s4 = sshll.u32 %s3863_s9, 4  ;;  %s3568_s5 = smov [#allocation17]   ;;  %s144_s4 = int_to_ptr.hbm [resolvable:$true] %s143_s4 }
  0x20   :  { %s99_s21 = sshll.u32 %s3886_s24, 4  ;;  %s145_s30 = sshll.u32 %s3568_s5, 4  ;;  %s100_s21 = int_to_ptr.hbm [resolvable:$true] %s99_s21  ;;  %s146_s30 = int_to_ptr.vmem [resolvable:$true] %s145_s30 }
  0x21   :  { %104 = dma.hbm_to_vmem [thread:$0]  %s100_s21, 32, %s102_s20, [#allocation12]  }
  0x22   :  { %126 = dma.hbm_to_vmem [thread:$0]  %s122_s26, 32, %s124_s28, [#allocation15]  }
  0x23   :  { %s166_s7 = sshll.u32 %s3865_s11, 4  ;;  %s3569_s1 = smov [#allocation20]   ;;  %s167_s7 = int_to_ptr.hbm [resolvable:$true] %s166_s7 }
  0x24   :  { %148 = dma.hbm_to_vmem [thread:$0]  %s144_s4, 16, %s146_s30, [#allocation18]  }
  0x25   :  { %s168_s20 = sshll.u32 %s3569_s1, 4  ;;  %s203_s2 = sshll.u32 %s3872_s18, 4  ;;  %s169_s20 = int_to_ptr.vmem [resolvable:$true] %s168_s20  ;;  %s204_s2 = int_to_ptr.hbm [resolvable:$true] %s203_s2 }
  0x26   :  { %s3570_s9 = smov 256   ;;  %s3571_s25 = smov 16  }
  0x27   :  { %174 = dma.hbm_to_vmem [thread:$0]  %s167_s7, 512, %s169_s20, [#allocation21], %s3570_s9, %s3570_s9, %s3571_s25  }
  0x28   :  { %s3887_s27 = sld [smem:[#allocation36_spill]]  ;;  %s3572_s28 = smov [#allocation23]  }
  0x29   :  { %s205_s29 = sshll.u32 %s3572_s28, 4  ;;  %s3573_s0 = smov [#allocation2]   ;;  %s206_s29 = int_to_ptr.vmem [resolvable:$true] %s205_s29 }
  0x2a   :  { %208 = dma.hbm_to_vmem [thread:$0]  %s204_s2, 32, %s206_s29, [#allocation24]  }
  0x2b   :  { %s42_s4 = sshll.u32 %s3573_s0, 4  ;;  %s3888_s30 = sld [smem:[#allocation38_spill]]  ;;  %s43_s4 = int_to_ptr.vmem [resolvable:$true] %s42_s4 }
  0x2c   :  { %s3574_s23 = smov [#allocation7]   ;;  %s3889_s21 = sld [smem:[#allocation40_spill]] }
  0x2d   :  { %s63_s7 = sshll.u32 %s3574_s23, 4  ;;  %s3575_s26 = smov 128   ;;  %s64_s7 = int_to_ptr.vmem [resolvable:$true] %s63_s7 }
  0x2e   :  { %s40_s11 = sshll.u32 %s3887_s27, 4  ;;  %s3576_s3 = smov 8   ;;  %s41_s11 = int_to_ptr.hbm [resolvable:$true] %s40_s11 }
  0x2f   :  { %45 = dma.hbm_to_vmem [thread:$0]  %s41_s11, 128, %s43_s4, [#allocation3]  }
  0x30   :  { %s3577_s2 = smov [#allocation10]   ;;  %s110_s11 = sshll.u32 %s3860_s6, 4  ;;  %s111_s11 = int_to_ptr.hbm [resolvable:$true] %s110_s11 }
  0x31   :  { %s61_s22 = sshll.u32 %s3888_s30, 4  ;;  %s87_s27 = sshll.u32 %s3577_s2, 4  ;;  %s62_s22 = int_to_ptr.hbm [resolvable:$true] %s61_s22  ;;  %s88_s27 = int_to_ptr.vmem [resolvable:$true] %s87_s27 }
  0x32   :  { %s85_s24 = sshll.u32 %s3889_s21, 4  ;;  %s132_s18 = sshll.u32 %s3862_s8, 4  ;;  %s86_s24 = int_to_ptr.hbm [resolvable:$true] %s85_s24  ;;  %s133_s18 = int_to_ptr.hbm [resolvable:$true] %s132_s18 }
  0x33   :  { %69 = dma.hbm_to_vmem [thread:$0]  %s62_s22, 1664, %s64_s7, [#allocation6], %s3575_s26, %s3575_s26, %s3576_s3  }
  0x34   :  { %93 = dma.hbm_to_vmem [thread:$0]  %s86_s24, 4096, %s88_s27, [#allocation9], %s3575_s26, %s3575_s26, %s3576_s3  }
  0x35   :  { %s3578_s5 = smov [#allocation13]   ;;  %s3579_s22 = smov [#allocation16]  }
  0x36   :  { %s112_s30 = sshll.u32 %s3578_s5, 4  ;;  %s134_s23 = sshll.u32 %s3579_s22, 4  ;;  %s113_s30 = int_to_ptr.vmem [resolvable:$true] %s112_s30  ;;  %s135_s23 = int_to_ptr.vmem [resolvable:$true] %s134_s23 }
  0x37   :  { %115 = dma.hbm_to_vmem [thread:$0]  %s111_s11, 32, %s113_s30, [#allocation12]  }
  0x38   :  { %s153_s6 = sshll.u32 %s3864_s10, 4  ;;  %s185_s24 = sshll.u32 %s3869_s15, 4  ;;  %s154_s6 = int_to_ptr.hbm [resolvable:$true] %s153_s6  ;;  %s186_s24 = int_to_ptr.hbm [resolvable:$true] %s185_s24 }
  0x39   :  { %137 = dma.hbm_to_vmem [thread:$0]  %s133_s18, 16, %s135_s23, [#allocation15]  }
  0x3a   :  { %s3580_s2 = smov [#allocation19]   ;;  %s3581_s27 = smov [#allocation22]  }
  0x3b   :  { %s155_s8 = sshll.u32 %s3580_s2, 4  ;;  %s187_s28 = sshll.u32 %s3581_s27, 4  ;;  %s156_s8 = int_to_ptr.vmem [resolvable:$true] %s155_s8  ;;  %s188_s28 = int_to_ptr.vmem [resolvable:$true] %s187_s28 }
  0x3c   :  { %161 = dma.hbm_to_vmem [thread:$0]  %s154_s6, 8192, %s156_s8, [#allocation18], %s3570_s9, %s3570_s9, %s3571_s25  }
  0x3d   :  { %s213_s10 = sshll.u32 %s3873_s19, 4  ;;  %s3582_s15 = smov [#allocation25]   ;;  %s214_s10 = int_to_ptr.hbm [resolvable:$true] %s213_s10 }
  0x3e   :  { %193 = dma.hbm_to_vmem [thread:$0]  %s186_s24, 8192, %s188_s28, [#allocation21], %s3575_s26, %s3575_s26, %s3576_s3  }
  0x3f   :  { %s215_s0 = sshll.u32 %s3582_s15, 4  ;;  %s3583_s4 = smov 64   ;;  %s216_s0 = int_to_ptr.vmem [resolvable:$true] %s215_s0 }
  0x40   :  { %s3584_s18 = smov 4  }
  0x41   :  { %221 = dma.hbm_to_vmem [thread:$0]  %s214_s10, 2048, %s216_s0, [#allocation24], %s3583_s4, %s3583_s4, %s3584_s18  }
  0x42   :  { %3546 = dma.done.wait [#allocation3], 128  }
  0x43   :  { %3547 = vsyncadd [#allocation3], 4294967168 }
  0x44   :  { %3548 = dma.done.wait [#allocation6], 1792  }
  0x45   :  { %3549 = vsyncadd [#allocation6], 4294965504 }
  0x46   :  { %3550 = dma.done.wait [#allocation9], 4128  }
  0x47   :  { %3551 = vsyncadd [#allocation9], 4294963168 }
  0x48   :  { %3552 = dma.done.wait [#allocation12], 64  }
  0x49   :  { %3553 = vsyncadd [#allocation12], 4294967232 }
  0x4a   :  { %3554 = dma.done.wait [#allocation15], 48  }
  0x4b   :  { %3555 = vsyncadd [#allocation15], 4294967248 }
  0x4c   :  { %3556 = dma.done.wait [#allocation18], 8208  }
  0x4d   :  { %3557 = vsyncadd [#allocation18], 4294959088 }
  0x4e   :  { %3558 = dma.done.wait [#allocation21], 8704  }
  0x4f   :  { %3559 = vsyncadd [#allocation21], 4294958592 }
  0x50   :  { %3560 = dma.done.wait [#allocation24], 2080  }
  0x51   :  { %3561 = vsyncadd [#allocation24], 4294965216  ;;  %v300_v0 = vld [vmem:[#allocation7 + $0x60] sm:$0x33]  ;;  %vm376_vm0 = vcmask 1041408   ;;  %vm372_vm1 = vcmask 818176  }
  0x52   :  { %v344_v1 = vunpack.c.l.b16 %v300_v0  ;;  %v345_v2 = vunpack.c.h.b16 %v300_v0  ;;  %v2185_v3 = vld [vmem:[#allocation7 + $0x50] sm:$0xf]  ;;  %v2928_v6 = vld [vmem:[#allocation7 + $0x54] sm:$0xf0]  ;;  %v2927_v7 = vld [vmem:[#allocation7 + $0x54] sm:$0xf] }
  0x53   :  { %v2187_v8 = vld [vmem:[#allocation7 + $0x58] sm:$0xf0]  ;;  %v2186_v11 = vor.u32 %v2928_v6, %v2185_v3  ;;  %v2177_v13 = vld [vmem:[#allocation7 + $0x40] sm:$0xf]  ;;  %v2926_v14 = vld [vmem:[#allocation7 + $0x44] sm:$0xf0] }
  0x54   :  { %v358_v4 = vpack.c.b16 %v344_v1, %v344_v1  ;;  %v359_v5 = vpack.c.b16 %v345_v2, %v345_v2  ;;  %v2190_v12 = vor.u32 %v2927_v7, %v2187_v8  ;;  %v2925_v15 = vld [vmem:[#allocation7 + $0x44] sm:$0xf]  ;;  %v2179_v16 = vld [vmem:[#allocation7 + $0x48] sm:$0xf0]  ;;  %v2251_v17 = vld [vmem:[#allocation10 + $0x70] sm:$0xf]  ;;  %v2178_v20 = vor.u32 %v2926_v14, %v2177_v13 }
  0x55   :  { %v2944_v18 = vld [vmem:[#allocation10 + $0x74] sm:$0xf0]  ;;  %v2315_v19 = vld [vmem:[#allocation10 + $0xf0] sm:$0xf]  ;;  %v2182_v21 = vor.u32 %v2925_v15, %v2179_v16  ;;  %v2169_v22 = vld [vmem:[#allocation7 + $0x30] sm:$0xf] }
  0x56   :  { %v378_v9 = vsel %vm376_vm0, %v358_v4, 0  ;;  %v381_v10 = vsel %vm376_vm0, %v359_v5, 0  ;;  %v2924_v23 = vld [vmem:[#allocation7 + $0x34] sm:$0xf0]  ;;  %v2252_v24 = vor.u32 %v2944_v18, %v2251_v17  ;;  %v2960_v25 = vld [vmem:[#allocation10 + $0xf4] sm:$0xf0] }
  0x57   :  { %384 = vmatpush.bf16.msra.mxu0 %v378_v9  ;;  %397 = vmatpush.bf16.msra.mxu1 %v381_v10  ;;  %v2923_v26 = vld [vmem:[#allocation7 + $0x34] sm:$0xf]  ;;  %v2171_v27 = vld [vmem:[#allocation7 + $0x38] sm:$0xf0]  ;;  %v2316_v28 = vor.u32 %v2960_v25, %v2315_v19  ;;  %v2243_v29 = vld [vmem:[#allocation10 + $0x60] sm:$0xf]  ;;  %v2170_v37 = vor.u32 %v2924_v23, %v2169_v22 }
  0x58   :  { %611 = vmatpush.bf16.msra.mxu2 %v2252_v24  ;;  %v2942_v30 = vld [vmem:[#allocation10 + $0x64] sm:$0xf0]  ;;  %v2307_v31 = vld [vmem:[#allocation10 + $0xe0] sm:$0xf]  ;;  %v2161_v33 = vld [vmem:[#allocation7 + $0x20] sm:$0xf]  ;;  %v2174_v38 = vor.u32 %v2923_v26, %v2171_v27 }
  0x59   :  { %v2958_v32 = vld [vmem:[#allocation10 + $0xe4] sm:$0xf0]  ;;  %v2922_v34 = vld [vmem:[#allocation7 + $0x24] sm:$0xf0]  ;;  %624 = vmatpush.bf16.msra.mxu3 %v2316_v28  ;;  %v2244_v35 = vor.u32 %v2942_v30, %v2243_v29  ;;  %v2921_v39 = vld [vmem:[#allocation7 + $0x24] sm:$0xf] }
  0x5a   :  { %v2308_v36 = vor.u32 %v2958_v32, %v2307_v31  ;;  %v2235_v40 = vld [vmem:[#allocation10 + $0x50] sm:$0xf]  ;;  %v2940_v41 = vld [vmem:[#allocation10 + $0x54] sm:$0xf0]  ;;  %v2163_v42 = vld [vmem:[#allocation7 + $0x28] sm:$0xf0]  ;;  %v2162_v49 = vor.u32 %v2922_v34, %v2161_v33 }
  0x5b   :  { %385 = vmatpush.bf16.msra.mxu0 %v2186_v11  ;;  %398 = vmatpush.bf16.msra.mxu1 %v2190_v12  ;;  %v2299_v43 = vld [vmem:[#allocation10 + $0xd0] sm:$0xf]  ;;  %v2956_v44 = vld [vmem:[#allocation10 + $0xd4] sm:$0xf0]  ;;  %v2236_v45 = vor.u32 %v2940_v41, %v2235_v40  ;;  %v2227_v47 = vld [vmem:[#allocation10 + $0x40] sm:$0xf]  ;;  %v2166_v50 = vor.u32 %v2921_v39, %v2163_v42 }
  0x5c   :  { %612 = vmatpush.bf16.msra.mxu2 %v2244_v35  ;;  %v2300_v46 = vor.u32 %v2956_v44, %v2299_v43  ;;  %v2938_v48 = vld [vmem:[#allocation10 + $0x44] sm:$0xf0]  ;;  %v2291_v52 = vld [vmem:[#allocation10 + $0xc0] sm:$0xf]  ;;  %v2920_v54 = vld [vmem:[#allocation7 + $0x14] sm:$0xf0] }
  0x5d   :  { %625 = vmatpush.bf16.msra.mxu3 %v2308_v36  ;;  %v2153_v51 = vld [vmem:[#allocation7 + $0x10] sm:$0xf]  ;;  %v2919_v55 = vld [vmem:[#allocation7 + $0x14] sm:$0xf]  ;;  %v2155_v56 = vld [vmem:[#allocation7 + $0x18] sm:$0xf0]  ;;  %v2228_v57 = vor.u32 %v2938_v48, %v2227_v47 }
  0x5e   :  { %v2954_v53 = vld [vmem:[#allocation10 + $0xc4] sm:$0xf0]  ;;  %v2145_v58 = vld [vmem:[#allocation7] sm:$0xf]  ;;  %v2918_v59 = vld [vmem:[#allocation7 + $0x4] sm:$0xf0]  ;;  %v2154_v63 = vor.u32 %v2920_v54, %v2153_v51  ;;  %v2158_v0 = vor.u32 %v2919_v55, %v2155_v56 }
  0x5f   :  { %386 = vmatpush.bf16.msra.mxu0 %v2178_v20  ;;  %399 = vmatpush.bf16.msra.mxu1 %v2182_v21  ;;  %v2292_v60 = vor.u32 %v2954_v53, %v2291_v52  ;;  %v2219_v61 = vld [vmem:[#allocation10 + $0x30] sm:$0xf]  ;;  %v2936_v62 = vld [vmem:[#allocation10 + $0x34] sm:$0xf0]  ;;  %v2147_v4 = vld [vmem:[#allocation7 + $0x8] sm:$0xf0]  ;;  %v2146_v13 = vor.u32 %v2918_v59, %v2145_v58 }
  0x60   :  { %613 = vmatpush.bf16.msra.mxu2 %v2236_v45  ;;  %v2917_v1 = vld [vmem:[#allocation7 + $0x4] sm:$0xf]  ;;  %v2283_v2 = vld [vmem:[#allocation10 + $0xb0] sm:$0xf]  ;;  %v2943_v5 = vld [vmem:[#allocation10 + $0x74] sm:$0xf]  ;;  %v2220_v9 = vor.u32 %v2936_v62, %v2219_v61 }
  0x61   :  { %626 = vmatpush.bf16.msra.mxu3 %v2300_v46  ;;  %v2952_v3 = vld [vmem:[#allocation10 + $0xb4] sm:$0xf0]  ;;  %v2253_v6 = vld [vmem:[#allocation10 + $0x78] sm:$0xf0]  ;;  %v2959_v7 = vld [vmem:[#allocation10 + $0xf4] sm:$0xf]  ;;  %v2150_v14 = vor.u32 %v2917_v1, %v2147_v4 }
  0x62   :  { %v2317_v8 = vld [vmem:[#allocation10 + $0xf8] sm:$0xf0]  ;;  %v2211_v10 = vld [vmem:[#allocation10 + $0x20] sm:$0xf]  ;;  %v2284_v11 = vor.u32 %v2952_v3, %v2283_v2  ;;  %v2934_v12 = vld [vmem:[#allocation10 + $0x24] sm:$0xf0]  ;;  %v2256_v16 = vor.u32 %v2943_v5, %v2253_v6 }
  0x63   :  { %387 = vmatpush.bf16.msra.mxu0 %v2170_v37  ;;  %400 = vmatpush.bf16.msra.mxu1 %v2174_v38  ;;  %v285_v15 = vld [vmem:[#allocation2] sm:$0xff]  ;;  %v2320_v17 = vor.u32 %v2959_v7, %v2317_v8  ;;  %v2275_v19 = vld [vmem:[#allocation10 + $0xa0] sm:$0xf]  ;;  %v2212_v24 = vor.u32 %v2934_v12, %v2211_v10  ;;  %v2939_v29 = vld [vmem:[#allocation10 + $0x54] sm:$0xf]  ;;  %vm670_vm2 = vcmask 72704  }
  0x64   :  { %614 = vmatpush.bf16.msra.mxu2 %v2228_v57  ;;  %v2941_v18 = vld [vmem:[#allocation10 + $0x64] sm:$0xf]  ;;  %v2950_v20 = vld [vmem:[#allocation10 + $0xa4] sm:$0xf0]  ;;  %v2245_v21 = vld [vmem:[#allocation10 + $0x68] sm:$0xf0]  ;;  %v287_v25 = vpack.c.bf16 %v285_v15, %v285_v15 }
  0x65   :  { %627 = vmatpush.bf16.msra.mxu3 %v2292_v60  ;;  %v2957_v22 = vld [vmem:[#allocation10 + $0xe4] sm:$0xf]  ;;  %v2309_v23 = vld [vmem:[#allocation10 + $0xe8] sm:$0xf0]  ;;  %v2276_v26 = vor.u32 %v2950_v20, %v2275_v19  ;;  %v2248_v27 = vor.u32 %v2941_v18, %v2245_v21  ;;  %v2237_v30 = vld [vmem:[#allocation10 + $0x58] sm:$0xf0] }
  0x66   :  { %v2312_v28 = vor.u32 %v2957_v22, %v2309_v23  ;;  %v2955_v31 = vld [vmem:[#allocation10 + $0xd4] sm:$0xf]  ;;  %v2301_v32 = vld [vmem:[#allocation10 + $0xd8] sm:$0xf0]  ;;  %v2240_v33 = vor.u32 %v2939_v29, %v2237_v30  ;;  %v2937_v35 = vld [vmem:[#allocation10 + $0x44] sm:$0xf] }
  0x67   :  { %388 = vmatpush.bf16.msra.mxu0 %v2162_v49  ;;  %401 = vmatpush.bf16.msra.mxu1 %v2166_v50  ;;  %v2304_v34 = vor.u32 %v2955_v31, %v2301_v32  ;;  %v2229_v36 = vld [vmem:[#allocation10 + $0x48] sm:$0xf0]  ;;  %v2953_v37 = vld [vmem:[#allocation10 + $0xc4] sm:$0xf]  ;;  %v2935_v41 = vld [vmem:[#allocation10 + $0x34] sm:$0xf] }
  0x68   :  { %615 = vmatpush.bf16.msra.mxu2 %v2220_v9  ;;  %v2293_v38 = vld [vmem:[#allocation10 + $0xc8] sm:$0xf0]  ;;  %v2232_v39 = vor.u32 %v2937_v35, %v2229_v36  ;;  %v2221_v42 = vld [vmem:[#allocation10 + $0x38] sm:$0xf0]  ;;  %v2951_v43 = vld [vmem:[#allocation10 + $0xb4] sm:$0xf] }
  0x69   :  { %628 = vmatpush.bf16.msra.mxu3 %v2284_v11  ;;  %v2296_v40 = vor.u32 %v2953_v37, %v2293_v38  ;;  %v2285_v44 = vld [vmem:[#allocation10 + $0xb8] sm:$0xf0]  ;;  %v2224_v45 = vor.u32 %v2935_v41, %v2221_v42  ;;  %v2933_v47 = vld [vmem:[#allocation10 + $0x24] sm:$0xf]  ;;  %v2213_v48 = vld [vmem:[#allocation10 + $0x28] sm:$0xf0] }
  0x6a   :  { %v2288_v46 = vor.u32 %v2951_v43, %v2285_v44  ;;  %v2949_v49 = vld [vmem:[#allocation10 + $0xa4] sm:$0xf]  ;;  %v2277_v50 = vld [vmem:[#allocation10 + $0xa8] sm:$0xf0]  ;;  %v2216_v51 = vor.u32 %v2933_v47, %v2213_v48  ;;  %v2203_v53 = vld [vmem:[#allocation10 + $0x10] sm:$0xf] }
  0x6b   :  { %389 = vmatpush.bf16.msra.mxu0 %v2154_v63  ;;  %402 = vmatpush.bf16.msra.mxu1 %v2158_v0  ;;  %v2280_v52 = vor.u32 %v2949_v49, %v2277_v50  ;;  %v2932_v54 = vld [vmem:[#allocation10 + $0x14] sm:$0xf0]  ;;  %v2267_v55 = vld [vmem:[#allocation10 + $0x90] sm:$0xf]  ;;  %v2931_v58 = vld [vmem:[#allocation10 + $0x14] sm:$0xf] }
  0x6c   :  { %616 = vmatpush.bf16.msra.mxu2 %v2212_v24  ;;  %v2204_v56 = vor.u32 %v2932_v54, %v2203_v53  ;;  %v2948_v57 = vld [vmem:[#allocation10 + $0x94] sm:$0xf0]  ;;  %v2205_v59 = vld [vmem:[#allocation10 + $0x18] sm:$0xf0]  ;;  %v2947_v62 = vld [vmem:[#allocation10 + $0x94] sm:$0xf] }
  0x6d   :  { %629 = vmatpush.bf16.msra.mxu3 %v2276_v26  ;;  %v2268_v60 = vor.u32 %v2948_v57, %v2267_v55  ;;  %v2208_v61 = vor.u32 %v2931_v58, %v2205_v59  ;;  %v2269_v63 = vld [vmem:[#allocation10 + $0x98] sm:$0xf0]  ;;  %v2195_v1 = vld [vmem:[#allocation10] sm:$0xf]  ;;  %v2930_v2 = vld [vmem:[#allocation10 + $0x4] sm:$0xf0] }
  0x6e   :  { %v2272_v0 = vor.u32 %v2947_v62, %v2269_v63  ;;  %v2259_v3 = vld [vmem:[#allocation10 + $0x80] sm:$0xf]  ;;  %v2196_v4 = vor.u32 %v2930_v2, %v2195_v1  ;;  %v2946_v5 = vld [vmem:[#allocation10 + $0x84] sm:$0xf0]  ;;  %v2929_v6 = vld [vmem:[#allocation10 + $0x4] sm:$0xf] }
  0x6f   :  { %390 = vmatpush.bf16.msra.mxu0 %v2146_v13  ;;  %403 = vmatpush.bf16.msra.mxu1 %v2150_v14  ;;  %v2197_v7 = vld [vmem:[#allocation10 + $0x8] sm:$0xf0]  ;;  %v2260_v8 = vor.u32 %v2946_v5, %v2259_v3  ;;  %v2945_v10 = vld [vmem:[#allocation10 + $0x84] sm:$0xf]  ;;  %v301_v13 = vld [vmem:[#allocation8] sm:$0x3] }
  0x70   :  { %617 = vmatpush.bf16.msra.mxu2 %v2204_v56  ;;  %v2200_v9 = vor.u32 %v2929_v6, %v2197_v7  ;;  %v2261_v11 = vld [vmem:[#allocation10 + $0x88] sm:$0xf0]  ;;  %v303_v14 = vperm.slane %v301_v13, 0  ;;  %v304_v15 = vperm.slane %v301_v13, 1  ;;  %v445_v26 = vld [vmem:[#allocation11] sm:$0x3] }
  0x71   :  { %630 = vmatpush.bf16.msra.mxu3 %v2268_v60  ;;  %v2264_v12 = vor.u32 %v2945_v10, %v2261_v11  ;;  %v447_v31 = vperm.slane %v445_v26, 0  ;;  %v3770_v49 = vld [vmem:[#allocation5] sm:$0xff]  ;;  %v2455_v53 = vld [vmem:[#allocation19 + $0xe0] sm:$0xf]  ;;  %v2991_v54 = vld [vmem:[#allocation19 + $0xec] sm:$0xf0] }
  0x72   :  { %2191 = vmatmul.msk.bf16.vlgmr.msra.gmra.mxu0 %vm372_vm1, %v287_v25  ;;  %2192 = vmatmul.msk.bf16.vlgmr.msra.gmra.mxu1 %vm372_vm1, %v287_v25  ;;  %v680_v50 = vmul.f32 %v3770_v49, %v3770_v49  ;;  %v2583_v55 = vld [vmem:[#allocation19 + $0x1e0] sm:$0xf]  ;;  %v2456_v56 = vor.u32 %v2991_v54, %v2455_v53  ;;  %v3023_v57 = vld [vmem:[#allocation19 + $0x1ec] sm:$0xf0]  ;;  %v3585_v10 = vmov 209.0   ;;  %vm830_vm4 = vcmask 1043456  }
  0x73   :  { %637 = vmatpush.bf16.msrb.mxu0 %v2256_v16  ;;  %650 = vmatpush.bf16.msrb.mxu1 %v2320_v17  ;;  %v2439_v58 = vld [vmem:[#allocation19 + $0xc0] sm:$0xf]  ;;  %v2987_v59 = vld [vmem:[#allocation19 + $0xcc] sm:$0xf0]  ;;  %v2584_v60 = vor.u32 %v3023_v57, %v2583_v55  ;;  %3138 = vrcp.f32 %v3585_v10  ;;  %v2447_v53 = vld [vmem:[#allocation19 + $0xc8] sm:$0xf] }
  0x74   :  { %618 = vmatpush.bf16.msra.mxu2 %v2196_v4  ;;  %v3019_v62 = vld [vmem:[#allocation19 + $0x1cc] sm:$0xf0]  ;;  %v2440_v63 = vor.u32 %v2987_v59, %v2439_v58  ;;  %v2423_v1 = vld [vmem:[#allocation19 + $0xa0] sm:$0xf]  ;;  %v2988_v54 = vld [vmem:[#allocation19 + $0xd4] sm:$0xf0] }
  0x75   :  { %631 = vmatpush.bf16.msra.mxu3 %v2260_v8  ;;  %v2983_v2 = vld [vmem:[#allocation19 + $0xac] sm:$0xf0]  ;;  %v2551_v3 = vld [vmem:[#allocation19 + $0x1a0] sm:$0xf]  ;;  %v2575_v55 = vld [vmem:[#allocation19 + $0x1c8] sm:$0xf]  ;;  %v2448_v57 = vor.u32 %v2988_v54, %v2447_v53 }
  0x76   :  { %v2424_v4 = vor.u32 %v2983_v2, %v2423_v1  ;;  %v3015_v5 = vld [vmem:[#allocation19 + $0x1ac] sm:$0xf0]  ;;  %v2407_v7 = vld [vmem:[#allocation19 + $0x80] sm:$0xf]  ;;  %v3020_v58 = vld [vmem:[#allocation19 + $0x1d4] sm:$0xf0] }
  0x77   :  { %638 = vmatpush.bf16.msrb.mxu0 %v2248_v27  ;;  %651 = vmatpush.bf16.msrb.mxu1 %v2312_v28  ;;  %v448_v27 = vperm.slane %v445_v26, 1  ;;  %v2552_v6 = vor.u32 %v3015_v5, %v2551_v3  ;;  %v2979_v8 = vld [vmem:[#allocation19 + $0x8c] sm:$0xf0]  ;;  %v2576_v59 = vor.u32 %v3020_v58, %v2575_v55  ;;  %v3016_v1 = vld [vmem:[#allocation19 + $0x1b4] sm:$0xf0]  ;;  %vm831_vm5 = vcmask 1044480  }
  0x78   :  { %v2408_v11 = vor.u32 %v2979_v8, %v2407_v7  ;;  %v2323_v2 = vld [vmem:[#allocation20] sm:$0xf]  ;;  %v3027_v3 = vld [vmem:[#allocation20 + $0xc] sm:$0x10]  ;;  %v3025_v7 = vld [vmem:[#allocation20 + $0x4] sm:$0xf] }
  0x79   :  { %v2325_v8 = vld [vmem:[#allocation20 + $0x10] sm:$0x10]  ;;  %v2367_v53 = vld [vmem:[#allocation19 + $0x28] sm:$0xf]  ;;  %v2968_v54 = vld [vmem:[#allocation19 + $0x34] sm:$0xf0] }
  0x7a   :  { %v2328_v10 = vor.u32 %v3025_v7, %v2325_v8  ;;  %v2495_v55 = vld [vmem:[#allocation19 + $0x128] sm:$0xf]  ;;  %v720_v7 = vld [vmem:[#allocation14] sm:$0x3]  ;;  %s3890_s22 = sld [smem:[#allocation42_spill]]  ;;  %s3589_s23 = smov [#allocation26]  }
  0x7b   :  { %639 = vmatpush.bf16.msrb.mxu0 %v2240_v33  ;;  %652 = vmatpush.bf16.msrb.mxu1 %v2304_v34  ;;  %s2124_s7 = sshll.u32 %s3589_s23, 4  ;;  %s3891_s20 = sld [smem:[#allocation43_spill]]  ;;  %s2125_s7 = int_to_ptr.vmem [resolvable:$true] %s2124_s7 }
  0x7f   :  { %640 = vmatpush.bf16.msrb.mxu0 %v2232_v39  ;;  %653 = vmatpush.bf16.msrb.mxu1 %v2296_v40 }
  0x81   :  { %s2126_s21 = sshll.u32 %s3891_s20, 4  ;;  %s2127_s21 = int_to_ptr.hbm [resolvable:$true] %s2126_s21 }
  0x83   :  { %641 = vmatpush.bf16.msrb.mxu0 %v2224_v45  ;;  %654 = vmatpush.bf16.msrb.mxu1 %v2288_v46 }
  0x87   :  { %642 = vmatpush.bf16.msrb.mxu0 %v2216_v51  ;;  %655 = vmatpush.bf16.msrb.mxu1 %v2280_v52  ;;  %v671_v51 = vsel %vm670_vm2, %v3770_v49, 0.0  ;;  %v681_v52 = vsel %vm670_vm2, %v680_v50, 0.0 }
  0x8b   :  { %643 = vmatpush.bf16.msrb.mxu0 %v2208_v61  ;;  %656 = vmatpush.bf16.msrb.mxu1 %v2272_v0  ;;  %v2567_v61 = vld [vmem:[#allocation19 + $0x1c0] sm:$0xf] }
  0x8c   :  { %v2568_v0 = vor.u32 %v3019_v62, %v2567_v61  ;;  %v2984_v61 = vld [vmem:[#allocation19 + $0xb4] sm:$0xf0]  ;;  %v2559_v62 = vld [vmem:[#allocation19 + $0x1a8] sm:$0xf] }
  0x8d   :  { %v2560_v5 = vor.u32 %v3016_v1, %v2559_v62  ;;  %v2479_v62 = vld [vmem:[#allocation19 + $0x108] sm:$0xf]  ;;  %v2996_v1 = vld [vmem:[#allocation19 + $0x114] sm:$0xf0] }
  0x8f   :  { %644 = vmatpush.bf16.msrb.mxu0 %v2200_v9  ;;  %657 = vmatpush.bf16.msrb.mxu1 %v2264_v12  ;;  %v2535_v9 = vld [vmem:[#allocation19 + $0x180] sm:$0xf]  ;;  %v3011_v12 = vld [vmem:[#allocation19 + $0x18c] sm:$0xf0] }
  0x90   :  { %v2536_v13 = vor.u32 %v3011_v12, %v2535_v9  ;;  %v2980_v12 = vld [vmem:[#allocation19 + $0x94] sm:$0xf0] }
  0x93   :  { %1218 = vmatpush.bf16.msra.mxu0 %v2456_v56  ;;  %1231 = vmatpush.bf16.msra.mxu1 %v2584_v60  ;;  %v2431_v60 = vld [vmem:[#allocation19 + $0xa8] sm:$0xf] }
  0x97   :  { %1219 = vmatpush.bf16.msra.mxu0 %v2440_v63  ;;  %1232 = vmatpush.bf16.msra.mxu1 %v2568_v0  ;;  %v2432_v0 = vor.u32 %v2984_v61, %v2431_v60  ;;  %v2351_v60 = vld [vmem:[#allocation19 + $0x8] sm:$0xf]  ;;  %v2964_v61 = vld [vmem:[#allocation19 + $0x14] sm:$0xf0] }
  0x9b   :  { %1220 = vmatpush.bf16.msra.mxu0 %v2424_v4  ;;  %1233 = vmatpush.bf16.msra.mxu1 %v2552_v6  ;;  %v2324_v6 = vor.u32 %v3027_v3, %v2323_v2  ;;  %v2480_v2 = vor.u32 %v2996_v1, %v2479_v62  ;;  %v2377_v62 = vld [vmem:[#allocation19 + $0x50] sm:$0xf0] }
  0x9f   :  { %1221 = vmatpush.bf16.msra.mxu0 %v2408_v11  ;;  %1234 = vmatpush.bf16.msra.mxu1 %v2536_v13  ;;  %v2415_v11 = vld [vmem:[#allocation19 + $0x88] sm:$0xf] }
  0xef   :  { %v392_v16 = vpop.f32.mrf.mxu0  ;;  %v405_v17 = vpop.f32.mrf.mxu1 }
  0xf0   :  { %v393_v18 = vadd.f32 %v392_v16, %v303_v14  ;;  %v406_v19 = vadd.f32 %v405_v17, %v304_v15  ;;  %v2391_v14 = vld [vmem:[#allocation19 + $0x60] sm:$0xf]  ;;  %v2975_v15 = vld [vmem:[#allocation19 + $0x6c] sm:$0xf0] }
  0xf1   :  { %v2519_v16 = vld [vmem:[#allocation19 + $0x160] sm:$0xf]  ;;  %v2392_v17 = vor.u32 %v2975_v15, %v2391_v14  ;;  %v3586_v14 = vmov 65535  }
  0xf2   :  { %v409_v20 = vmax.f32 %v393_v18, 0.0  ;;  %v410_v21 = vmax.f32 %v406_v19, 0.0  ;;  %v3007_v18 = vld [vmem:[#allocation19 + $0x16c] sm:$0xf0]  ;;  %v832_v15 = vsel %vm830_vm4, 4294967295, %v3586_v14 }
  0xf3   :  { %v2520_v19 = vor.u32 %v3007_v18, %v2519_v16  ;;  %1222 = vmatpush.bf16.msra.mxu0 %v2392_v17  ;;  %v2416_v16 = vor.u32 %v2980_v12, %v2415_v11  ;;  %v2543_v17 = vld [vmem:[#allocation19 + $0x188] sm:$0xf]  ;;  %v3012_v18 = vld [vmem:[#allocation19 + $0x194] sm:$0xf0]  ;;  %v3135_v12 = vld [vmem:[#allocation16] ss:$0 sm:$0xff] }
  0xf4   :  { %v411_v22 = vpack.c.bf16 %v409_v20, %v409_v20  ;;  %v412_v23 = vpack.c.bf16 %v410_v21, %v410_v21 }
  0xf5   :  { %1235 = vmatpush.bf16.msra.mxu1 %v2520_v19 }
  0xf6   :  { %619 = vmatmul.bf16.vlgmr.msra.gmra.mxu2 %v411_v22  ;;  %632 = vmatmul.bf16.vlgmr.msra.gmra.mxu3 %v412_v23 }
  0xf7   :  { %645 = vmatmul.bf16.vlgmr.msrb.gmra.mxu0 %v411_v22  ;;  %658 = vmatmul.bf16.vlgmr.msrb.gmra.mxu1 %v412_v23  ;;  %v394_v24 = vpop.f32.mrf.mxu0  ;;  %v407_v25 = vpop.f32.mrf.mxu1  ;;  %v2971_v22 = vld [vmem:[#allocation19 + $0x4c] sm:$0xf0]  ;;  %v2503_v23 = vld [vmem:[#allocation19 + $0x140] sm:$0xf] }
  0xf8   :  { %v3003_v25 = vld [vmem:[#allocation19 + $0x14c] sm:$0xf0] }
 0x174   :  { %v646_v28 = vpop.f32.mrf.mxu0  ;;  %v659_v29 = vpop.f32.mrf.mxu1 }
 0x175   :  { %v647_v30 = vadd.f32 %v646_v28, %v448_v27  ;;  %v2504_v27 = vor.u32 %v3003_v25, %v2503_v23  ;;  %v2359_v28 = vld [vmem:[#allocation19 + $0x20] sm:$0xf]  ;;  %v2331_v23 = vld [vmem:[#allocation20 + $0x8] sm:$0xf] }
 0x177   :  { %v660_v32 = vadd.f32 %v659_v29, %v647_v30  ;;  %1236 = vmatpush.bf16.msra.mxu1 %v2504_v27  ;;  %v2967_v29 = vld [vmem:[#allocation19 + $0x2c] sm:$0xf0]  ;;  %v2487_v30 = vld [vmem:[#allocation19 + $0x120] sm:$0xf] }
 0x179   :  { %v620_v33 = vpop.f32.mrf.mxu2  ;;  %v633_v34 = vpop.f32.mrf.mxu3  ;;  %v664_v35 = vmax.f32 %v660_v32, 0.0  ;;  %v2999_v32 = vld [vmem:[#allocation19 + $0x12c] sm:$0xf0] }
 0x17a   :  { %v621_v36 = vadd.f32 %v620_v33, %v447_v31  ;;  %v2360_v31 = vor.u32 %v2967_v29, %v2359_v28  ;;  %v3026_v28 = vld [vmem:[#allocation20 + $0xc] sm:$0xf]  ;;  %v2333_v29 = vld [vmem:[#allocation20 + $0x18] sm:$0x10] }
 0x17b   :  { %v3760_v40 = vadd.f32 %v664_v35, %v410_v21  ;;  %v2375_v21 = vld [vmem:[#allocation19 + $0x40] sm:$0xf] }
 0x17c   :  { %v634_v37 = vadd.f32 %v633_v34, %v621_v36  ;;  %v648_v38 = vpop.f32.mrf.mxu0  ;;  %v661_v39 = vpop.f32.mrf.mxu1  ;;  %v2376_v24 = vor.u32 %v2971_v22, %v2375_v21  ;;  %v2488_v34 = vor.u32 %v2999_v32, %v2487_v30  ;;  %v2343_v35 = vld [vmem:[#allocation19] sm:$0xf]  ;;  %v2963_v36 = vld [vmem:[#allocation19 + $0xc] sm:$0xf0]  ;;  %v833_v21 = vsel %vm831_vm5, %v832_v15, 0 }
 0x17d   :  { %v676_v47 = vmul.f32 %v3760_v40, %v3760_v40  ;;  %v2344_v38 = vor.u32 %v2963_v36, %v2343_v35  ;;  %v2995_v39 = vld [vmem:[#allocation19 + $0x10c] sm:$0xf0]  ;;  %v2544_v22 = vor.u32 %v3012_v18, %v2543_v17  ;;  %v835_v25 = vand.u32 %v2324_v6, %v833_v21  ;;  %v2399_v36 = vld [vmem:[#allocation19 + $0x68] sm:$0xf]  ;;  %v712_v6 = vld [vmem:[#allocation13] sm:$0x3] }
 0x17e   :  { %v663_v41 = vmax.f32 %v634_v37, 0.0  ;;  %1223 = vmatpush.bf16.msra.mxu0 %v2376_v24  ;;  %1237 = vmatpush.bf16.msra.mxu1 %v2488_v34  ;;  %v2471_v37 = vld [vmem:[#allocation19 + $0x100] sm:$0xf]  ;;  %v3028_v24 = vld [vmem:[#allocation20 + $0x14] sm:$0x10]  ;;  %v715_v14 = vperm.slane %v712_v6, 1 }
 0x17f   :  { %v2332_v27 = vor.u32 %v3028_v24, %v2331_v23  ;;  %853 = vmatpush.bf16.msrb.mxu2 %v835_v25  ;;  %v3136_v18 = vld [vmem:[#allocation17] ss:$0 sm:$0xff]  ;;  %v2989_v25 = vld [vmem:[#allocation19 + $0xe4] sm:$0xf] }
 0x180   :  { %v3762_v42 = vadd.f32 %v663_v41, %v409_v20  ;;  %v3139_v20 = vpop.eup %3138  ;;  %v2463_v41 = vld [vmem:[#allocation19 + $0xe8] sm:$0xf] }
 0x181   :  { %v622_v43 = vpop.f32.mrf.mxu2  ;;  %v635_v44 = vpop.f32.mrf.mxu3  ;;  %v686_v26 = vmul.f32 209.0, %v3139_v20  ;;  %vm690_vm3 = vweird.f32 %v3139_v20  ;;  %v841_v32 = vand.u32 %v2332_v27, %v833_v21  ;;  %v2585_v27 = vld [vmem:[#allocation19 + $0x1f0] sm:$0xf0] }
 0x182   :  { %v667_v45 = vadd.f32 %v3760_v40, %v3762_v42  ;;  %v675_v46 = vmul.f32 %v3762_v42, %v3762_v42  ;;  %1224 = vmatpush.bf16.msra.mxu0 %v2360_v31  ;;  %v2992_v43 = vld [vmem:[#allocation19 + $0xf4] sm:$0xf0] }
 0x183   :  { %v687_v33 = vsub.f32 1.0, %v686_v26  ;;  %v838_v26 = vand.u32 %v2328_v10, %v833_v21  ;;  %879 = vmatpush.bf16.msra.mxu2 %v841_v32 }
 0x184   :  { %668 = vadd.xlane.f32.xlu0 %v667_v45  ;;  %v677_v48 = vadd.f32 %v676_v47, %v675_v46  ;;  %v2472_v45 = vor.u32 %v2995_v39, %v2471_v37  ;;  %v2464_v46 = vor.u32 %v2992_v43, %v2463_v41  ;;  %v2591_v47 = vld [vmem:[#allocation19 + $0x1e8] sm:$0xf]  ;;  %v2976_v37 = vld [vmem:[#allocation19 + $0x74] sm:$0xf0] }
 0x185   :  { %v688_v44 = vmul.f32 %v3139_v20, %v687_v33  ;;  %866 = vmatpush.bf16.msrb.mxu3 %v838_v26  ;;  %v2336_v33 = vor.u32 %v3026_v28, %v2333_v29  ;;  %v2527_v39 = vld [vmem:[#allocation19 + $0x168] sm:$0xf]  ;;  %v3008_v41 = vld [vmem:[#allocation19 + $0x174] sm:$0xf0]  ;;  %v2457_v26 = vld [vmem:[#allocation19 + $0xf0] sm:$0xf0] }
 0x186   :  { %678 = vadd.xlane.f32.xlu1 %v677_v48  ;;  %v3024_v48 = vld [vmem:[#allocation19 + $0x1f4] sm:$0xf0]  ;;  %1225 = vmatpush.bf16.msra.mxu0 %v2344_v38  ;;  %v2400_v38 = vor.u32 %v2976_v37, %v2399_v36  ;;  %v2460_v29 = vor.u32 %v2989_v25, %v2457_v26  ;;  %v3017_v36 = vld [vmem:[#allocation19 + $0x1c4] sm:$0xf]  ;;  %v2569_v37 = vld [vmem:[#allocation19 + $0x1d0] sm:$0xf0] }
 0x187   :  { %1238 = vmatpush.bf16.msra.mxu1 %v2472_v45  ;;  %v689_v56 = vadd.f32 %v3139_v20, %v688_v44  ;;  %v844_v35 = vand.u32 %v2336_v33, %v833_v21  ;;  %v2528_v44 = vor.u32 %v3008_v41, %v2527_v39  ;;  %v2572_v39 = vor.u32 %v3017_v36, %v2569_v37  ;;  %v2981_v41 = vld [vmem:[#allocation19 + $0xa4] sm:$0xf] }
 0x189   :  { %v691_v63 = vsel %vm690_vm3, %v3139_v20, %v689_v56  ;;  %892 = vmatpush.bf16.msra.mxu3 %v844_v35  ;;  %v2368_v56 = vor.u32 %v2968_v54, %v2367_v53  ;;  %v2441_v35 = vld [vmem:[#allocation19 + $0xd0] sm:$0xf0] }
 0x18a   :  { %1270 = vmatpush.bf16.msrb.mxu0 %v2464_v46  ;;  %v2383_v46 = vld [vmem:[#allocation19 + $0x48] sm:$0xf] }
 0x18c   :  { %672 = vadd.xlane.f32.xlu0 %v671_v51  ;;  %v2592_v51 = vor.u32 %v3024_v48, %v2591_v47  ;;  %v2972_v47 = vld [vmem:[#allocation19 + $0x54] sm:$0xf0] }
 0x18d   :  { %v2384_v48 = vor.u32 %v2972_v47, %v2383_v46 }
 0x18e   :  { %682 = vadd.xlane.f32.xlu1 %v681_v52  ;;  %1283 = vmatpush.bf16.msrb.mxu1 %v2592_v51  ;;  %v3004_v51 = vld [vmem:[#allocation19 + $0x154] sm:$0xf0] }
 0x18f   :  { %1271 = vmatpush.bf16.msrb.mxu0 %v2448_v57  ;;  %v3000_v57 = vld [vmem:[#allocation19 + $0x134] sm:$0xf0] }
 0x190   :  { %v2496_v58 = vor.u32 %v3000_v57, %v2495_v55  ;;  %v2973_v55 = vld [vmem:[#allocation19 + $0x64] sm:$0xf] }
 0x191   :  { %v3005_v57 = vld [vmem:[#allocation19 + $0x164] sm:$0xf] }
 0x192   :  { %1284 = vmatpush.bf16.msrb.mxu1 %v2576_v59 }
 0x193   :  { %1272 = vmatpush.bf16.msrb.mxu0 %v2432_v0  ;;  %v2352_v0 = vor.u32 %v2964_v61, %v2351_v60  ;;  %v2969_v61 = vld [vmem:[#allocation19 + $0x44] sm:$0xf] }
 0x194   :  { %v2380_v1 = vor.u32 %v2969_v61, %v2377_v62  ;;  %v2994_v61 = vld [vmem:[#allocation19 + $0x10c] sm:$0xf]  ;;  %v2481_v62 = vld [vmem:[#allocation19 + $0x118] sm:$0xf0] }
 0x196   :  { %1285 = vmatpush.bf16.msrb.mxu1 %v2560_v5 }
 0x197   :  { %1273 = vmatpush.bf16.msrb.mxu0 %v2416_v16  ;;  %v722_v16 = vperm.slane %v720_v7, 0 }
 0x19a   :  { %1286 = vmatpush.bf16.msrb.mxu1 %v2544_v22  ;;  %v723_v22 = vperm.slane %v720_v7, 1 }
 0x19b   :  { %1274 = vmatpush.bf16.msrb.mxu0 %v2400_v38 }
 0x19e   :  { %1287 = vmatpush.bf16.msrb.mxu1 %v2528_v44  ;;  %v3013_v44 = vld [vmem:[#allocation19 + $0x1a4] sm:$0xf] }
 0x19f   :  { %1275 = vmatpush.bf16.msrb.mxu0 %v2384_v48  ;;  %v2977_v48 = vld [vmem:[#allocation19 + $0x84] sm:$0xf] }
 0x1a3   :  { %1276 = vmatpush.bf16.msrb.mxu0 %v2368_v56  ;;  %v2393_v56 = vld [vmem:[#allocation19 + $0x70] sm:$0xf0] }
 0x1a7   :  { %1277 = vmatpush.bf16.msrb.mxu0 %v2352_v0  ;;  %v2505_v0 = vld [vmem:[#allocation19 + $0x150] sm:$0xf0] }
 0x1f7   :  { %v669_v50 = vpop.xlane.xlu0 %668 }
 0x1f9   :  { %v679_v52 = vpop.xlane.xlu1 %678 }
 0x1ff   :  { %v673_v4 = vpop.xlane.xlu0 %672 }
 0x200   :  { %v674_v9 = vadd.f32 %v673_v4, %v669_v50  ;;  %v2511_v50 = vld [vmem:[#allocation19 + $0x148] sm:$0xf] }
 0x201   :  { %v683_v13 = vpop.xlane.xlu1 %682 }
 0x202   :  { %v3777_v19 = vmul.f32 %v691_v63, %v674_v9  ;;  %v684_v20 = vadd.f32 %v683_v13, %v679_v52  ;;  %v2512_v52 = vor.u32 %v3004_v51, %v2511_v50  ;;  %v714_v13 = vperm.slane %v712_v6, 0  ;;  %v2409_v50 = vld [vmem:[#allocation19 + $0x90] sm:$0xf0]  ;;  %v3009_v51 = vld [vmem:[#allocation19 + $0x184] sm:$0xf] }
 0x203   :  { %v2412_v53 = vor.u32 %v2977_v48, %v2409_v50  ;;  %v2489_v6 = vld [vmem:[#allocation19 + $0x130] sm:$0xf0]  ;;  %v3002_v48 = vld [vmem:[#allocation19 + $0x14c] sm:$0xf]  ;;  %v2513_v50 = vld [vmem:[#allocation19 + $0x158] sm:$0xf0] }
 0x204   :  { %v693_v30 = vmul.f32 %v691_v63, %v684_v20  ;;  %v694_v31 = vmul.f32 %v3777_v19, %v3777_v19  ;;  %1288 = vmatpush.bf16.msrb.mxu1 %v2512_v52  ;;  %v708_v8 = vsub.f32 %v3762_v42, %v3777_v19  ;;  %v709_v10 = vsub.f32 %v3760_v40, %v3777_v19  ;;  %v3021_v40 = vld [vmem:[#allocation19 + $0x1e4] sm:$0xf]  ;;  %v2537_v52 = vld [vmem:[#allocation19 + $0x190] sm:$0xf0] }
 0x205   :  { %v728_v11 = vsub.f32 %v3770_v49, %v3777_v19  ;;  %v2588_v33 = vor.u32 %v3021_v40, %v2585_v27  ;;  %v2540_v54 = vor.u32 %v3009_v51, %v2537_v52  ;;  %v2982_v40 = vld [vmem:[#allocation19 + $0xac] sm:$0xf]  ;;  %v2433_v27 = vld [vmem:[#allocation19 + $0xb8] sm:$0xf0]  ;;  %v2516_v52 = vor.u32 %v3002_v48, %v2513_v50  ;;  %v3044_v48 = vld [vmem:[#allocation22 + $0x74] sm:$0xf0] }
 0x206   :  { %v695_v34 = vsub.f32 %v693_v30, %v694_v31  ;;  %v2719_v50 = vld [vmem:[#allocation22 + $0xf0] sm:$0xf] }
 0x208   :  { %v696_v43 = vmax.f32 %v695_v34, 0.0  ;;  %1289 = vmatpush.bf16.msrb.mxu1 %v2496_v58  ;;  %v2985_v34 = vld [vmem:[#allocation19 + $0xc4] sm:$0xf]  ;;  %v2521_v58 = vld [vmem:[#allocation19 + $0x170] sm:$0xf0] }
 0x209   :  { %v2444_v38 = vor.u32 %v2985_v34, %v2441_v35  ;;  %v2524_v60 = vor.u32 %v3005_v57, %v2521_v58  ;;  %v3010_v34 = vld [vmem:[#allocation19 + $0x18c] sm:$0xf]  ;;  %v2545_v35 = vld [vmem:[#allocation19 + $0x198] sm:$0xf0] }
 0x20a   :  { %v697_v45 = vadd.f32 1e-05, %v696_v43  ;;  %v2425_v43 = vld [vmem:[#allocation19 + $0xb0] sm:$0xf0]  ;;  %v2548_v37 = vor.u32 %v3010_v34, %v2545_v35 }
 0x20b   :  { %v2428_v46 = vor.u32 %v2981_v41, %v2425_v43  ;;  %v3006_v41 = vld [vmem:[#allocation19 + $0x16c] sm:$0xf]  ;;  %v2529_v43 = vld [vmem:[#allocation19 + $0x178] sm:$0xf0] }
 0x20c   :  { %3140 = vrsqrt.f32 %v697_v45  ;;  %1290 = vmatpush.bf16.msrb.mxu1 %v2480_v2  ;;  %vm704_vm7 = vweird.f32 %v697_v45 }
 0x212   :  { %v3141_v59 = vpop.eup %3140 }
 0x213   :  { %v699_v63 = vmul.f32 %v3141_v59, %v697_v45  ;;  %vm705_vm6 = vweird.f32 %v3141_v59  ;;  %v2553_v45 = vld [vmem:[#allocation19 + $0x1b0] sm:$0xf0] }
 0x214   :  { %vm706_vm8 = vmor %vm704_vm7, %vm705_vm6  ;;  %v2556_v47 = vor.u32 %v3013_v44, %v2553_v45  ;;  %v2532_v45 = vor.u32 %v3006_v41, %v2529_v43 }
 0x215   :  { %v700_v3 = vmul.f32 %v3141_v59, %v699_v63  ;;  %v3001_v63 = vld [vmem:[#allocation19 + $0x144] sm:$0xf] }
 0x216   :  { %v2508_v2 = vor.u32 %v3001_v63, %v2505_v0  ;;  %v2484_v0 = vor.u32 %v2994_v61, %v2481_v62  ;;  %v3042_v61 = vld [vmem:[#allocation22 + $0x64] sm:$0xf0]  ;;  %v2711_v62 = vld [vmem:[#allocation22 + $0xe0] sm:$0xf] }
 0x217   :  { %v701_v4 = vmul.f32 0.5, %v700_v3  ;;  %v2965_v3 = vld [vmem:[#allocation19 + $0x24] sm:$0xf] }
 0x219   :  { %v702_v5 = vsub.f32 1.5, %v701_v4  ;;  %v2361_v4 = vld [vmem:[#allocation19 + $0x30] sm:$0xf0] }
 0x21a   :  { %v2364_v7 = vor.u32 %v2965_v3, %v2361_v4 }
 0x21b   :  { %v703_v9 = vmul.f32 %v3141_v59, %v702_v5  ;;  %v2997_v5 = vld [vmem:[#allocation19 + $0x124] sm:$0xf] }
 0x21d   :  { %v707_v15 = vsel %vm706_vm8, %v3141_v59, %v703_v9  ;;  %v2396_v59 = vor.u32 %v2973_v55, %v2393_v56  ;;  %v2961_v9 = vld [vmem:[#allocation19 + $0x4] sm:$0xf]  ;;  %v2998_v55 = vld [vmem:[#allocation19 + $0x12c] sm:$0xf]  ;;  %v2497_v56 = vld [vmem:[#allocation19 + $0x138] sm:$0xf0] }
 0x21e   :  { %v729_v17 = vmul.f32 %v728_v11, %v707_v15  ;;  %v710_v20 = vmul.f32 %v708_v8, %v707_v15  ;;  %v711_v21 = vmul.f32 %v709_v10, %v707_v15  ;;  %v2492_v8 = vor.u32 %v2997_v5, %v2489_v6  ;;  %v2345_v10 = vld [vmem:[#allocation19 + $0x10] sm:$0xf0]  ;;  %v2993_v11 = vld [vmem:[#allocation19 + $0x104] sm:$0xf]  ;;  %v3022_v15 = vld [vmem:[#allocation19 + $0x1ec] sm:$0xf] }
 0x21f   :  { %v2500_v58 = vor.u32 %v2998_v55, %v2497_v56 }
 0x220   :  { %v734_v42 = vmul.f32 %v3135_v12, %v729_v17  ;;  %v718_v23 = vmul.f32 %v714_v13, %v710_v20  ;;  %v719_v24 = vmul.f32 %v715_v14, %v711_v21  ;;  %v2473_v12 = vld [vmem:[#allocation19 + $0x110] sm:$0xf0]  ;;  %v2990_v13 = vld [vmem:[#allocation19 + $0xec] sm:$0xf]  ;;  %v2465_v14 = vld [vmem:[#allocation19 + $0xf8] sm:$0xf0]  ;;  %v2348_v17 = vor.u32 %v2961_v9, %v2345_v10 }
 0x221   :  { %v2468_v20 = vor.u32 %v2990_v13, %v2465_v14 }
 0x222   :  { %v739_v28 = vadd.f32 %v3136_v18, %v734_v42  ;;  %v726_v49 = vadd.f32 %v722_v16, %v718_v23  ;;  %v727_v19 = vadd.f32 %v723_v22, %v719_v24  ;;  %v2593_v16 = vld [vmem:[#allocation19 + $0x1f8] sm:$0xf0]  ;;  %v2476_v18 = vor.u32 %v2993_v11, %v2473_v12  ;;  %v2986_v22 = vld [vmem:[#allocation19 + $0xcc] sm:$0xf] }
 0x223   :  { %v2596_v21 = vor.u32 %v3022_v15, %v2593_v16  ;;  %v2449_v42 = vld [vmem:[#allocation19 + $0xd8] sm:$0xf0]  ;;  %v3018_v23 = vld [vmem:[#allocation19 + $0x1cc] sm:$0xf] }
 0x224   :  { %v806_v30 = vpack.c.bf16 %v739_v28, %v739_v28  ;;  %v3788_v31 = vpack.c.bf16 %v726_v49, %v726_v49  ;;  %v3790_v32 = vpack.c.bf16 %v727_v19, %v727_v19  ;;  %v2577_v24 = vld [vmem:[#allocation19 + $0x1d8] sm:$0xf0]  ;;  %v2452_v25 = vor.u32 %v2986_v22, %v2449_v42  ;;  %v3014_v28 = vld [vmem:[#allocation19 + $0x1ac] sm:$0xf] }
 0x225   :  { %v2580_v26 = vor.u32 %v3018_v23, %v2577_v24  ;;  %v2561_v49 = vld [vmem:[#allocation19 + $0x1b8] sm:$0xf0]  ;;  %v2436_v19 = vor.u32 %v2982_v40, %v2433_v27 }
 0x226   :  { %2337 = vmatmul.msk.bf16.vlgmr.msrb.gmra.mxu2 %vm670_vm2, %v806_v30  ;;  %2338 = vmatmul.msk.bf16.vlgmr.msrb.gmra.mxu3 %vm670_vm2, %v806_v30  ;;  %v1322_v22 = vld [vmem:[%s3866_s12] sm:$0xf] }
 0x227   :  { %1226 = vmatmul.bf16.vlgmr.msra.gmra.mxu0 %v3788_v31  ;;  %1239 = vmatmul.bf16.vlgmr.msra.gmra.mxu1 %v3790_v32  ;;  %v1325_v23 = vperm.slane %v1322_v22, 1 }
 0x228   :  { %1244 = vmatpush.bf16.msrb.mxu2 %v2460_v29  ;;  %1257 = vmatpush.bf16.msrb.mxu3 %v2588_v33  ;;  %v2564_v29 = vor.u32 %v3014_v28, %v2561_v49  ;;  %v2417_v33 = vld [vmem:[#allocation19 + $0x98] sm:$0xf0]  ;;  %v1326_v49 = vperm.slane %v1322_v22, 2 }
 0x22c   :  { %1245 = vmatpush.bf16.msrb.mxu2 %v2444_v38  ;;  %1258 = vmatpush.bf16.msrb.mxu3 %v2572_v39  ;;  %v2974_v38 = vld [vmem:[#allocation19 + $0x6c] sm:$0xf]  ;;  %v2401_v39 = vld [vmem:[#allocation19 + $0x78] sm:$0xf0] }
 0x22d   :  { %v2404_v44 = vor.u32 %v2974_v38, %v2401_v39 }
 0x230   :  { %1246 = vmatpush.bf16.msrb.mxu2 %v2428_v46  ;;  %1259 = vmatpush.bf16.msrb.mxu3 %v2556_v47  ;;  %v2970_v46 = vld [vmem:[#allocation19 + $0x4c] sm:$0xf]  ;;  %v2385_v47 = vld [vmem:[#allocation19 + $0x58] sm:$0xf0] }
 0x231   :  { %v2388_v51 = vor.u32 %v2970_v46, %v2385_v47  ;;  %v2655_v47 = vld [vmem:[#allocation22 + $0x70] sm:$0xf] }
 0x234   :  { %1247 = vmatpush.bf16.msrb.mxu2 %v2412_v53  ;;  %1260 = vmatpush.bf16.msrb.mxu3 %v2540_v54  ;;  %v2966_v53 = vld [vmem:[#allocation19 + $0x2c] sm:$0xf]  ;;  %v2369_v54 = vld [vmem:[#allocation19 + $0x38] sm:$0xf0] }
 0x235   :  { %v2372_v57 = vor.u32 %v2966_v53, %v2369_v54  ;;  %v2783_v53 = vld [vmem:[#allocation22 + $0x170] sm:$0xf]  ;;  %v3076_v54 = vld [vmem:[#allocation22 + $0x174] sm:$0xf0] }
 0x236   :  { %2339 = vmatmul.msk.bf16.vlgmr.msra.gmra.mxu2 %vm670_vm2, %v806_v30  ;;  %2340 = vmatmul.msk.bf16.vlgmr.msra.gmra.mxu3 %vm670_vm2, %v806_v30  ;;  %v2978_v30 = vld [vmem:[#allocation19 + $0x8c] sm:$0xf]  ;;  %v2784_v56 = vor.u32 %v3076_v54, %v2783_v53  ;;  %v3052_v53 = vld [vmem:[#allocation22 + $0xb4] sm:$0xf0]  ;;  %v2751_v54 = vld [vmem:[#allocation22 + $0x130] sm:$0xf] }
 0x237   :  { %1278 = vmatmul.bf16.vlgmr.msrb.gmra.mxu0 %v3788_v31  ;;  %1291 = vmatmul.bf16.vlgmr.msrb.gmra.mxu1 %v3790_v32  ;;  %v2420_v36 = vor.u32 %v2978_v30, %v2417_v33  ;;  %v1327_v33 = vperm.slane %v1322_v22, 3 }
 0x238   :  { %1248 = vmatpush.bf16.msrb.mxu2 %v2396_v59  ;;  %1261 = vmatpush.bf16.msrb.mxu3 %v2524_v60  ;;  %v2962_v59 = vld [vmem:[#allocation19 + $0xc] sm:$0xf]  ;;  %v2353_v60 = vld [vmem:[#allocation19 + $0x18] sm:$0xf0] }
 0x239   :  { %v2356_v63 = vor.u32 %v2962_v59, %v2353_v60  ;;  %v2647_v59 = vld [vmem:[#allocation22 + $0x60] sm:$0xf] }
 0x23c   :  { %1249 = vmatpush.bf16.msrb.mxu2 %v2380_v1  ;;  %1262 = vmatpush.bf16.msrb.mxu3 %v2508_v2 }
 0x240   :  { %1250 = vmatpush.bf16.msrb.mxu2 %v2364_v7  ;;  %1263 = vmatpush.bf16.msrb.mxu3 %v2492_v8 }
 0x244   :  { %1251 = vmatpush.bf16.msrb.mxu2 %v2348_v17  ;;  %1264 = vmatpush.bf16.msrb.mxu3 %v2476_v18 }
 0x247   :  { %1252 = vmatmul.bf16.vlgmr.msrb.gmra.mxu2 %v3788_v31  ;;  %1265 = vmatmul.bf16.vlgmr.msrb.gmra.mxu3 %v3790_v32 }
 0x248   :  { %1296 = vmatpush.bf16.msra.mxu2 %v2468_v20  ;;  %1309 = vmatpush.bf16.msra.mxu3 %v2596_v21 }
 0x24c   :  { %1297 = vmatpush.bf16.msra.mxu2 %v2452_v25  ;;  %1310 = vmatpush.bf16.msra.mxu3 %v2580_v26  ;;  %v1324_v25 = vperm.slane %v1322_v22, 0 }
 0x250   :  { %1298 = vmatpush.bf16.msra.mxu2 %v2436_v19  ;;  %1311 = vmatpush.bf16.msra.mxu3 %v2564_v29 }
 0x254   :  { %1299 = vmatpush.bf16.msra.mxu2 %v2420_v36  ;;  %1312 = vmatpush.bf16.msra.mxu3 %v2548_v37 }
 0x258   :  { %1300 = vmatpush.bf16.msra.mxu2 %v2404_v44  ;;  %1313 = vmatpush.bf16.msra.mxu3 %v2532_v45  ;;  %v3587_v44 = vmov 512.0  }
 0x259   :  { %3142 = vrcp.f32 %v3587_v44 }
 0x25c   :  { %1301 = vmatpush.bf16.msra.mxu2 %v2388_v51  ;;  %1314 = vmatpush.bf16.msra.mxu3 %v2516_v52  ;;  %v2656_v51 = vor.u32 %v3044_v48, %v2655_v47  ;;  %v3060_v52 = vld [vmem:[#allocation22 + $0xf4] sm:$0xf0]  ;;  %v2623_v48 = vld [vmem:[#allocation22 + $0x30] sm:$0xf] }
 0x25d   :  { %v2720_v55 = vor.u32 %v3060_v52, %v2719_v50  ;;  %v3036_v50 = vld [vmem:[#allocation22 + $0x34] sm:$0xf0] }
 0x25e   :  { %1804 = vmatpush.bf16.msra.mxu0 %v2656_v51  ;;  %v2687_v51 = vld [vmem:[#allocation22 + $0xb0] sm:$0xf]  ;;  %v2624_v52 = vor.u32 %v3036_v50, %v2623_v48  ;;  %v3041_v48 = vld [vmem:[#allocation22 + $0x64] sm:$0xf]  ;;  %v2649_v50 = vld [vmem:[#allocation22 + $0x68] sm:$0xf0] }
 0x25f   :  { %v3143_v45 = vpop.eup %3142  ;;  %1817 = vmatpush.bf16.msra.mxu1 %v2720_v55  ;;  %v3068_v55 = vld [vmem:[#allocation22 + $0x134] sm:$0xf0] }
 0x260   :  { %1302 = vmatpush.bf16.msra.mxu2 %v2372_v57  ;;  %1315 = vmatpush.bf16.msra.mxu3 %v2500_v58  ;;  %v1344_v46 = vmul.f32 512.0, %v3143_v45  ;;  %v2847_v57 = vld [vmem:[#allocation22 + $0x1f0] sm:$0xf]  ;;  %v3092_v58 = vld [vmem:[#allocation22 + $0x1f4] sm:$0xf0]  ;;  %vm1348_vm9 = vweird.f32 %v3143_v45 }
 0x261   :  { %v2848_v60 = vor.u32 %v3092_v58, %v2847_v57  ;;  %v2752_v57 = vor.u32 %v3068_v55, %v2751_v54  ;;  %v2815_v58 = vld [vmem:[#allocation22 + $0x1b0] sm:$0xf]  ;;  %v2713_v54 = vld [vmem:[#allocation22 + $0xe8] sm:$0xf0]  ;;  %v3073_v55 = vld [vmem:[#allocation22 + $0x164] sm:$0xf] }
 0x264   :  { %1303 = vmatpush.bf16.msra.mxu2 %v2356_v63  ;;  %1316 = vmatpush.bf16.msra.mxu3 %v2484_v0  ;;  %v3058_v63 = vld [vmem:[#allocation22 + $0xe4] sm:$0xf0]  ;;  %v2648_v0 = vor.u32 %v3042_v61, %v2647_v59  ;;  %v3084_v59 = vld [vmem:[#allocation22 + $0x1b4] sm:$0xf0]  ;;  %v2615_v61 = vld [vmem:[#allocation22 + $0x20] sm:$0xf] }
 0x266   :  { %1805 = vmatpush.bf16.msra.mxu0 %v2648_v0 }
 0x267   :  { %1304 = vmatmul.bf16.vlgmr.msra.gmra.mxu2 %v3788_v31  ;;  %1317 = vmatmul.bf16.vlgmr.msra.gmra.mxu3 %v3790_v32 }
 0x268   :  { %1830 = vmatpush.bf16.msrb.mxu2 %v2784_v56  ;;  %1843 = vmatpush.bf16.msrb.mxu3 %v2848_v60  ;;  %v2688_v56 = vor.u32 %v3052_v53, %v2687_v51  ;;  %v2816_v60 = vor.u32 %v3084_v59, %v2815_v58  ;;  %v3057_v53 = vld [vmem:[#allocation22 + $0xe4] sm:$0xf]  ;;  %v2841_v59 = vld [vmem:[#allocation22 + $0x1e8] sm:$0xf0] }
 0x269   :  { %v3089_v58 = vld [vmem:[#allocation22 + $0x1e4] sm:$0xf] }
 0x2a4   :  { %v1227_v1 = vpop.f32.mrf.mxu0  ;;  %v1240_v2 = vpop.f32.mrf.mxu1 }
 0x2a9   :  { %v855_v3 = vpop.f32.mrf.mxu2  ;;  %v868_v4 = vpop.f32.mrf.mxu3 }
 0x2aa   :  { %v1228_v21 = vadd.f32 %v1227_v1, %v855_v3  ;;  %v2712_v1 = vor.u32 %v3058_v63, %v2711_v62  ;;  %v3074_v3 = vld [vmem:[#allocation22 + $0x164] sm:$0xf0]  ;;  %v2679_v63 = vld [vmem:[#allocation22 + $0xa0] sm:$0xf] }
 0x2ab   :  { %v3034_v62 = vld [vmem:[#allocation22 + $0x24] sm:$0xf0] }
 0x2ac   :  { %v1229_v5 = vpop.f32.mrf.mxu0  ;;  %v1242_v6 = vpop.f32.mrf.mxu1  ;;  %v1241_v24 = vadd.f32 %v1240_v2, %v1228_v21  ;;  %v2775_v2 = vld [vmem:[#allocation22 + $0x160] sm:$0xf]  ;;  %1818 = vmatpush.bf16.msra.mxu1 %v2712_v1  ;;  %v2616_v0 = vor.u32 %v3034_v62, %v2615_v61  ;;  %v3050_v1 = vld [vmem:[#allocation22 + $0xa4] sm:$0xf0]  ;;  %v2844_v61 = vor.u32 %v3089_v58, %v2841_v59  ;;  %v3039_v62 = vld [vmem:[#allocation22 + $0x54] sm:$0xf] }
 0x2ad   :  { %v1345_v5 = vsub.f32 1.0, %v1344_v46  ;;  %v2776_v6 = vor.u32 %v3074_v3, %v2775_v2  ;;  %v3086_v46 = vld [vmem:[#allocation22 + $0x1c4] sm:$0xf0]  ;;  %v2743_v2 = vld [vmem:[#allocation22 + $0x120] sm:$0xf] }
 0x2ae   :  { %v1332_v27 = vadd.f32 %v1324_v25, %v1241_v24  ;;  %v3040_v24 = vld [vmem:[#allocation22 + $0x54] sm:$0xf0]  ;;  %v2703_v25 = vld [vmem:[#allocation22 + $0xd0] sm:$0xf]  ;;  %v3066_v3 = vld [vmem:[#allocation22 + $0x124] sm:$0xf0] }
 0x2af   :  { %1831 = vmatpush.bf16.msrb.mxu2 %v2776_v6  ;;  %v2807_v6 = vld [vmem:[#allocation22 + $0x1a0] sm:$0xf]  ;;  %v2673_v58 = vld [vmem:[#allocation22 + $0x98] sm:$0xf0] }
 0x2b1   :  { %v857_v7 = vpop.f32.mrf.mxu2  ;;  %v870_v8 = vpop.f32.mrf.mxu3 }
 0x2b2   :  { %v3090_v7 = vld [vmem:[#allocation22 + $0x1e4] sm:$0xf0] }
 0x2b4   :  { %v1279_v9 = vpop.f32.mrf.mxu0  ;;  %v1292_v10 = vpop.f32.mrf.mxu1 }
 0x2b9   :  { %v881_v11 = vpop.f32.mrf.mxu2  ;;  %v894_v12 = vpop.f32.mrf.mxu3 }
 0x2ba   :  { %v1280_v26 = vadd.f32 %v1279_v9, %v881_v11  ;;  %v1346_v9 = vmul.f32 %v3143_v45, %v1345_v5  ;;  %v2744_v5 = vor.u32 %v3066_v3, %v2743_v2  ;;  %v3071_v2 = vld [vmem:[#allocation22 + $0x154] sm:$0xf]  ;;  %v2769_v3 = vld [vmem:[#allocation22 + $0x158] sm:$0xf0] }
 0x2bc   :  { %v1281_v13 = vpop.f32.mrf.mxu0  ;;  %v1294_v14 = vpop.f32.mrf.mxu1  ;;  %v1293_v28 = vadd.f32 %v1292_v10, %v1280_v26  ;;  %v1347_v10 = vadd.f32 %v3143_v45, %v1346_v9  ;;  %v2607_v9 = vld [vmem:[#allocation22 + $0x10] sm:$0xf] }
 0x2be   :  { %v1334_v36 = vadd.f32 %v1326_v49, %v1293_v28  ;;  %v3807_v11 = vsel %vm1348_vm9, %v3143_v45, %v1347_v10  ;;  %v3072_v28 = vld [vmem:[#allocation22 + $0x154] sm:$0xf0]  ;;  %v2823_v45 = vld [vmem:[#allocation22 + $0x1c0] sm:$0xf] }
 0x2bf   :  { %v2824_v47 = vor.u32 %v3086_v46, %v2823_v45  ;;  %v3032_v10 = vld [vmem:[#allocation22 + $0x14] sm:$0xf0]  ;;  %v3091_v45 = vld [vmem:[#allocation22 + $0x1f4] sm:$0xf] }
 0x2c1   :  { %v883_v15 = vpop.f32.mrf.mxu2  ;;  %v896_v16 = vpop.f32.mrf.mxu3 }
 0x2ca   :  { %v1253_v17 = vpop.f32.mrf.mxu2  ;;  %v1266_v31 = vpop.f32.mrf.mxu3 }
 0x2cb   :  { %v1254_v20 = vadd.f32 %v1253_v17, %v868_v4  ;;  %v2839_v4 = vld [vmem:[#allocation22 + $0x1e0] sm:$0xf] }
 0x2cc   :  { %v2840_v8 = vor.u32 %v3090_v7, %v2839_v4  ;;  %v2680_v4 = vor.u32 %v3050_v1, %v2679_v63  ;;  %v3082_v7 = vld [vmem:[#allocation22 + $0x1a4] sm:$0xf0]  ;;  %v2641_v63 = vld [vmem:[#allocation22 + $0x58] sm:$0xf0] }
 0x2cd   :  { %v1267_v42 = vadd.f32 %v1266_v31, %v1254_v20  ;;  %v2705_v1 = vld [vmem:[#allocation22 + $0xd8] sm:$0xf0] }
 0x2ce   :  { %1844 = vmatpush.bf16.msrb.mxu3 %v2840_v8  ;;  %v2808_v8 = vor.u32 %v3082_v7, %v2807_v6  ;;  %v3087_v6 = vld [vmem:[#allocation22 + $0x1d4] sm:$0xf]  ;;  %v2833_v7 = vld [vmem:[#allocation22 + $0x1d8] sm:$0xf0] }
 0x2cf   :  { %v1333_v40 = vadd.f32 %v1325_v23, %v1267_v42  ;;  %v2639_v23 = vld [vmem:[#allocation22 + $0x50] sm:$0xf] }
 0x2d0   :  { %v2640_v26 = vor.u32 %v3040_v24, %v2639_v23  ;;  %v2599_v24 = vld [vmem:[#allocation22] sm:$0xf] }
 0x2d1   :  { %v1338_v34 = vadd.f32 %v1333_v40, %v1332_v27 }
 0x2d2   :  { %v1255_v18 = vpop.f32.mrf.mxu2  ;;  %v1268_v32 = vpop.f32.mrf.mxu3  ;;  %1806 = vmatpush.bf16.msra.mxu0 %v2640_v26  ;;  %v2663_v26 = vld [vmem:[#allocation22 + $0x80] sm:$0xf] }
 0x2d3   :  { %v1339_v38 = vadd.f32 %v1338_v34, %v1334_v36  ;;  %v2631_v34 = vld [vmem:[#allocation22 + $0x40] sm:$0xf] }
 0x2ea   :  { %v1305_v19 = vpop.f32.mrf.mxu2  ;;  %v1318_v29 = vpop.f32.mrf.mxu3 }
 0x2eb   :  { %v1306_v30 = vadd.f32 %v1305_v19, %v894_v12 }
 0x2ed   :  { %v1319_v35 = vadd.f32 %v1318_v29, %v1306_v30  ;;  %v2831_v29 = vld [vmem:[#allocation22 + $0x1d0] sm:$0xf]  ;;  %v3088_v30 = vld [vmem:[#allocation22 + $0x1d4] sm:$0xf0] }
 0x2ef   :  { %v1335_v37 = vadd.f32 %v1327_v33, %v1319_v35  ;;  %v2832_v33 = vor.u32 %v3088_v30, %v2831_v29  ;;  %v3038_v35 = vld [vmem:[#allocation22 + $0x44] sm:$0xf0]  ;;  %v2791_v30 = vld [vmem:[#allocation22 + $0x180] sm:$0xf] }
 0x2f1   :  { %v1340_v39 = vadd.f32 %v1339_v38, %v1335_v37  ;;  %1845 = vmatpush.bf16.msrb.mxu3 %v2832_v33  ;;  %v3054_v38 = vld [vmem:[#allocation22 + $0xc4] sm:$0xf0] }
 0x2f2   :  { %v1307_v41 = vpop.f32.mrf.mxu2  ;;  %v1320_v43 = vpop.f32.mrf.mxu3  ;;  %v3078_v33 = vld [vmem:[#allocation22 + $0x184] sm:$0xf0] }
 0x2f3   :  { %1341 = vadd.xlane.f32.xlu2 %v1340_v39  ;;  %v2759_v39 = vld [vmem:[#allocation22 + $0x140] sm:$0xf]  ;;  %v3070_v41 = vld [vmem:[#allocation22 + $0x144] sm:$0xf0] }
 0x2f4   :  { %v2760_v44 = vor.u32 %v3070_v41, %v2759_v39 }
 0x2f5   :  { %1846 = vmatpush.bf16.msrb.mxu3 %v2824_v47  ;;  %v2849_v47 = vld [vmem:[#allocation22 + $0x1f8] sm:$0xf0] }
 0x2f6   :  { %v2852_v51 = vor.u32 %v3091_v45, %v2849_v47  ;;  %v3065_v47 = vld [vmem:[#allocation22 + $0x124] sm:$0xf] }
 0x2f9   :  { %1847 = vmatpush.bf16.msrb.mxu3 %v2816_v60 }
 0x2fd   :  { %1848 = vmatpush.bf16.msrb.mxu3 %v2808_v8  ;;  %v3037_v8 = vld [vmem:[#allocation22 + $0x44] sm:$0xf] }
 0x366   :  { %v1342_v12 = vpop.xlane.xlu2 %1341 }
 0x367   :  { %v1350_v13 = vmul.f32 %v3807_v11, %v1342_v12  ;;  %v2671_v12 = vld [vmem:[#allocation22 + $0x90] sm:$0xf] }
 0x369   :  { %v3810_v14 = vsub.f32 %v1332_v27, %v1350_v13  ;;  %v3812_v15 = vsub.f32 %v1333_v40, %v1350_v13  ;;  %v3814_v16 = vsub.f32 %v1334_v36, %v1350_v13  ;;  %v3816_v17 = vsub.f32 %v1335_v37, %v1350_v13  ;;  %v3056_v40 = vld [vmem:[#allocation22 + $0xd4] sm:$0xf0]  ;;  %v2767_v27 = vld [vmem:[#allocation22 + $0x150] sm:$0xf]  ;;  %v2695_v36 = vld [vmem:[#allocation22 + $0xc0] sm:$0xf] }
 0x36a   :  { %v2704_v49 = vor.u32 %v3056_v40, %v2703_v25  ;;  %v2768_v19 = vor.u32 %v3072_v28, %v2767_v27  ;;  %v2632_v37 = vor.u32 %v3038_v35, %v2631_v34  ;;  %v2696_v43 = vor.u32 %v3054_v38, %v2695_v36  ;;  %v3030_v25 = vld [vmem:[#allocation22 + $0x4] sm:$0xf0]  ;;  %v2727_v28 = vld [vmem:[#allocation22 + $0x100] sm:$0xf]  ;;  %v3043_v34 = vld [vmem:[#allocation22 + $0x74] sm:$0xf] }
 0x36b   :  { %v1355_v31 = vmul.f32 %v3810_v14, %v3810_v14  ;;  %v1356_v18 = vmul.f32 %v3812_v15, %v3812_v15  ;;  %v1357_v32 = vmul.f32 %v3814_v16, %v3814_v16  ;;  %v1358_v21 = vmul.f32 %v3816_v17, %v3816_v17  ;;  %v3046_v27 = vld [vmem:[#allocation22 + $0x84] sm:$0xf0]  ;;  %v2657_v36 = vld [vmem:[#allocation22 + $0x78] sm:$0xf0] }
 0x36c   :  { %1819 = vmatpush.bf16.msra.mxu1 %v2704_v49  ;;  %1832 = vmatpush.bf16.msrb.mxu2 %v2768_v19  ;;  %v2608_v13 = vor.u32 %v3032_v10, %v2607_v9  ;;  %v2600_v40 = vor.u32 %v3030_v25, %v2599_v24  ;;  %v3062_v49 = vld [vmem:[#allocation22 + $0x104] sm:$0xf0]  ;;  %v2664_v19 = vor.u32 %v3046_v27, %v2663_v26  ;;  %v2721_v38 = vld [vmem:[#allocation22 + $0xf8] sm:$0xf0]  ;;  %v2633_v10 = vld [vmem:[#allocation22 + $0x48] sm:$0xf0] }
 0x36d   :  { %v1359_v20 = vadd.f32 %v1356_v18, %v1355_v31  ;;  %1807 = vmatpush.bf16.msra.mxu0 %v2632_v37  ;;  %v3048_v31 = vld [vmem:[#allocation22 + $0x94] sm:$0xf0]  ;;  %v2735_v18 = vld [vmem:[#allocation22 + $0x110] sm:$0xf]  ;;  %v2728_v29 = vor.u32 %v3062_v49, %v2727_v28  ;;  %v2792_v35 = vor.u32 %v3078_v33, %v2791_v30  ;;  %v3059_v37 = vld [vmem:[#allocation22 + $0xf4] sm:$0xf]  ;;  %v2660_v39 = vor.u32 %v3043_v34, %v2657_v36 }
 0x36e   :  { %v2724_v41 = vor.u32 %v3059_v37, %v2721_v38  ;;  %v2772_v9 = vor.u32 %v3071_v2, %v2769_v3  ;;  %v3035_v27 = vld [vmem:[#allocation22 + $0x34] sm:$0xf]  ;;  %v2625_v28 = vld [vmem:[#allocation22 + $0x38] sm:$0xf0]  ;;  %v3033_v37 = vld [vmem:[#allocation22 + $0x24] sm:$0xf] }
 0x36f   :  { %v1360_v22 = vadd.f32 %v1359_v20, %v1357_v32  ;;  %v3064_v32 = vld [vmem:[#allocation22 + $0x114] sm:$0xf0]  ;;  %v2672_v20 = vor.u32 %v3048_v31, %v2671_v12  ;;  %v3053_v12 = vld [vmem:[#allocation22 + $0xc4] sm:$0xf]  ;;  %v2836_v31 = vor.u32 %v3087_v6, %v2833_v7  ;;  %v3051_v49 = vld [vmem:[#allocation22 + $0xb4] sm:$0xf] }
 0x370   :  { %1820 = vmatpush.bf16.msra.mxu1 %v2696_v43  ;;  %1833 = vmatpush.bf16.msrb.mxu2 %v2760_v44  ;;  %v3075_v43 = vld [vmem:[#allocation22 + $0x174] sm:$0xf]  ;;  %v2785_v44 = vld [vmem:[#allocation22 + $0x178] sm:$0xf0]  ;;  %v3029_v3 = vld [vmem:[#allocation22 + $0x4] sm:$0xf] }
 0x371   :  { %v1361_v42 = vadd.f32 %v1360_v22, %v1358_v21  ;;  %1808 = vmatpush.bf16.msra.mxu0 %v2624_v52  ;;  %v2736_v21 = vor.u32 %v3064_v32, %v2735_v18  ;;  %v2799_v22 = vld [vmem:[#allocation22 + $0x190] sm:$0xf]  ;;  %v2788_v46 = vor.u32 %v3075_v43, %v2785_v44  ;;  %v2652_v52 = vor.u32 %v3041_v48, %v2649_v50  ;;  %v3069_v18 = vld [vmem:[#allocation22 + $0x144] sm:$0xf]  ;;  %v2761_v32 = vld [vmem:[#allocation22 + $0x148] sm:$0xf0] }
 0x372   :  { %v2764_v25 = vor.u32 %v3069_v18, %v2761_v32  ;;  %v2753_v30 = vld [vmem:[#allocation22 + $0x138] sm:$0xf0]  ;;  %v2681_v43 = vld [vmem:[#allocation22 + $0xa8] sm:$0xf0]  ;;  %v3081_v50 = vld [vmem:[#allocation22 + $0x1a4] sm:$0xf] }
 0x373   :  { %1362 = vadd.xlane.f32.xlu2 %v1361_v42  ;;  %v3080_v42 = vld [vmem:[#allocation22 + $0x194] sm:$0xf0]  ;;  %v2817_v36 = vld [vmem:[#allocation22 + $0x1b8] sm:$0xf0]  ;;  %v2745_v48 = vld [vmem:[#allocation22 + $0x128] sm:$0xf0] }
 0x374   :  { %1821 = vmatpush.bf16.msra.mxu1 %v2688_v56  ;;  %1834 = vmatpush.bf16.msrb.mxu2 %v2752_v57  ;;  %v2800_v23 = vor.u32 %v3080_v42, %v2799_v22  ;;  %v2716_v56 = vor.u32 %v3057_v53, %v2713_v54  ;;  %v2777_v57 = vld [vmem:[#allocation22 + $0x168] sm:$0xf0]  ;;  %v3031_v54 = vld [vmem:[#allocation22 + $0x14] sm:$0xf]  ;;  %v2801_v2 = vld [vmem:[#allocation22 + $0x198] sm:$0xf0] }
 0x375   :  { %1809 = vmatpush.bf16.msra.mxu0 %v2616_v0  ;;  %v2780_v60 = vor.u32 %v3073_v55, %v2777_v57  ;;  %v3055_v0 = vld [vmem:[#allocation22 + $0xd4] sm:$0xf]  ;;  %v2825_v22 = vld [vmem:[#allocation22 + $0x1c8] sm:$0xf0]  ;;  %v2609_v55 = vld [vmem:[#allocation22 + $0x18] sm:$0xf0] }
 0x376   :  { %1849 = vmatpush.bf16.msrb.mxu3 %v2800_v23  ;;  %v2636_v23 = vor.u32 %v3037_v8, %v2633_v10  ;;  %v2809_v53 = vld [vmem:[#allocation22 + $0x1a8] sm:$0xf0]  ;;  %v3047_v57 = vld [vmem:[#allocation22 + $0x94] sm:$0xf]  ;;  %v3045_v7 = vld [vmem:[#allocation22 + $0x84] sm:$0xf] }
 0x377   :  { %v2665_v8 = vld [vmem:[#allocation22 + $0x88] sm:$0xf0] }
 0x378   :  { %1822 = vmatpush.bf16.msra.mxu1 %v2680_v4  ;;  %1835 = vmatpush.bf16.msrb.mxu2 %v2744_v5  ;;  %v2644_v4 = vor.u32 %v3039_v62, %v2641_v63  ;;  %v2708_v5 = vor.u32 %v3055_v0, %v2705_v1  ;;  %v2737_v62 = vld [vmem:[#allocation22 + $0x118] sm:$0xf0]  ;;  %v3079_v63 = vld [vmem:[#allocation22 + $0x194] sm:$0xf]  ;;  %v2676_v0 = vor.u32 %v3047_v57, %v2673_v58  ;;  %v2729_v10 = vld [vmem:[#allocation22 + $0x108] sm:$0xf0] }
 0x379   :  { %1810 = vmatpush.bf16.msra.mxu0 %v2608_v13  ;;  %v2697_v13 = vld [vmem:[#allocation22 + $0xc8] sm:$0xf0]  ;;  %v2804_v6 = vor.u32 %v3079_v63, %v2801_v2 }
 0x37a   :  { %1850 = vmatpush.bf16.msrb.mxu3 %v2792_v35  ;;  %v2700_v24 = vor.u32 %v3053_v12, %v2697_v13  ;;  %v3083_v35 = vld [vmem:[#allocation22 + $0x1b4] sm:$0xf]  ;;  %v3077_v12 = vld [vmem:[#allocation22 + $0x184] sm:$0xf]  ;;  %v2793_v32 = vld [vmem:[#allocation22 + $0x188] sm:$0xf0] }
 0x37b   :  { %v2820_v38 = vor.u32 %v3083_v35, %v2817_v36 }
 0x37c   :  { %1823 = vmatpush.bf16.msra.mxu1 %v2672_v20  ;;  %1836 = vmatpush.bf16.msrb.mxu2 %v2736_v21  ;;  %v3085_v21 = vld [vmem:[#allocation22 + $0x1c4] sm:$0xf] }
 0x37d   :  { %1811 = vmatpush.bf16.msra.mxu0 %v2600_v40  ;;  %v2828_v40 = vor.u32 %v3085_v21, %v2825_v22  ;;  %v2668_v21 = vor.u32 %v3045_v7, %v2665_v8 }
 0x37e   :  { %1895 = vmatpush.bf16.msra.mxu3 %v2852_v51 }
 0x380   :  { %1824 = vmatpush.bf16.msra.mxu1 %v2664_v19  ;;  %1837 = vmatpush.bf16.msrb.mxu2 %v2728_v29  ;;  %v2689_v19 = vld [vmem:[#allocation22 + $0xb8] sm:$0xf0]  ;;  %v3067_v29 = vld [vmem:[#allocation22 + $0x134] sm:$0xf] }
 0x381   :  { %1856 = vmatpush.bf16.msrb.mxu0 %v2660_v39  ;;  %v2692_v33 = vor.u32 %v3051_v49, %v2689_v19  ;;  %v2756_v34 = vor.u32 %v3067_v29, %v2753_v30  ;;  %v2617_v39 = vld [vmem:[#allocation22 + $0x28] sm:$0xf0] }
 0x382   :  { %1896 = vmatpush.bf16.msra.mxu3 %v2844_v61  ;;  %v2620_v45 = vor.u32 %v3033_v37, %v2617_v39  ;;  %v3063_v61 = vld [vmem:[#allocation22 + $0x114] sm:$0xf] }
 0x383   :  { %v2740_v1 = vor.u32 %v3063_v61, %v2737_v62 }
 0x384   :  { %1869 = vmatpush.bf16.msrb.mxu1 %v2724_v41  ;;  %1882 = vmatpush.bf16.msra.mxu2 %v2788_v46  ;;  %v3049_v41 = vld [vmem:[#allocation22 + $0xa4] sm:$0xf] }
 0x385   :  { %1857 = vmatpush.bf16.msrb.mxu0 %v2652_v52  ;;  %v2684_v46 = vor.u32 %v3049_v41, %v2681_v43  ;;  %v2748_v52 = vor.u32 %v3065_v47, %v2745_v48 }
 0x386   :  { %1897 = vmatpush.bf16.msra.mxu3 %v2836_v31  ;;  %v1336_v31 = vld [vmem:[%s3867_s13] sm:$0xf] }
 0x388   :  { %1870 = vmatpush.bf16.msrb.mxu1 %v2716_v56  ;;  %1883 = vmatpush.bf16.msra.mxu2 %v2780_v60  ;;  %v2812_v56 = vor.u32 %v3081_v50, %v2809_v53  ;;  %v2612_v60 = vor.u32 %v3031_v54, %v2609_v55 }
 0x389   :  { %1858 = vmatpush.bf16.msrb.mxu0 %v2644_v4  ;;  %v2601_v4 = vld [vmem:[#allocation22 + $0x8] sm:$0xf0] }
 0x38a   :  { %1898 = vmatpush.bf16.msra.mxu3 %v2828_v40  ;;  %v2604_v18 = vor.u32 %v3029_v3, %v2601_v4  ;;  %v1383_v40 = vperm.slane %v1336_v31, 2 }
 0x38c   :  { %1871 = vmatpush.bf16.msrb.mxu1 %v2708_v5  ;;  %1884 = vmatpush.bf16.msra.mxu2 %v2772_v9  ;;  %v3061_v9 = vld [vmem:[#allocation22 + $0x104] sm:$0xf] }
 0x38d   :  { %1859 = vmatpush.bf16.msrb.mxu0 %v2636_v23  ;;  %v2796_v23 = vor.u32 %v3077_v12, %v2793_v32 }
 0x38e   :  { %1899 = vmatpush.bf16.msra.mxu3 %v2820_v38 }
 0x390   :  { %1872 = vmatpush.bf16.msrb.mxu1 %v2700_v24  ;;  %1885 = vmatpush.bf16.msra.mxu2 %v2764_v25  ;;  %v1381_v24 = vperm.slane %v1336_v31, 0  ;;  %v1382_v25 = vperm.slane %v1336_v31, 1 }
 0x392   :  { %1900 = vmatpush.bf16.msra.mxu3 %v2812_v56  ;;  %v1478_v56 = vld [vmem:[%s3870_s16] sm:$0x3] }
 0x393   :  { %v1480_v57 = vperm.slane %v1478_v56, 0  ;;  %v1481_v58 = vperm.slane %v1478_v56, 1 }
 0x394   :  { %1873 = vmatpush.bf16.msrb.mxu1 %v2692_v33  ;;  %1886 = vmatpush.bf16.msra.mxu2 %v2756_v34 }
 0x396   :  { %1901 = vmatpush.bf16.msra.mxu3 %v2804_v6 }
 0x398   :  { %1874 = vmatpush.bf16.msrb.mxu1 %v2684_v46  ;;  %1887 = vmatpush.bf16.msra.mxu2 %v2748_v52 }
 0x39a   :  { %1902 = vmatpush.bf16.msra.mxu3 %v2796_v23 }
 0x39c   :  { %1875 = vmatpush.bf16.msrb.mxu1 %v2676_v0  ;;  %1888 = vmatpush.bf16.msra.mxu2 %v2740_v1 }
 0x3a0   :  { %1876 = vmatpush.bf16.msrb.mxu1 %v2668_v21 }
 0x3e6   :  { %v1363_v20 = vpop.xlane.xlu2 %1362 }
 0x3e7   :  { %v1364_v42 = vmul.f32 %v1363_v20, %v3807_v11  ;;  %v2628_v11 = vor.u32 %v3035_v27, %v2625_v28  ;;  %v1337_v20 = vld [vmem:[%s3868_s14] sm:$0xf]  ;;  %v1384_v27 = vperm.slane %v1336_v31, 3 }
 0x3e8   :  { %v1394_v49 = vperm.slane %v1337_v20, 0  ;;  %v1396_v19 = vperm.slane %v1337_v20, 2  ;;  %v1397_v34 = vperm.slane %v1337_v20, 3 }
 0x3e9   :  { %v3827_v26 = vadd.f32 1e-05, %v1364_v42  ;;  %1860 = vmatpush.bf16.msrb.mxu0 %v2628_v11  ;;  %v2732_v42 = vor.u32 %v3061_v9, %v2729_v10  ;;  %v1395_v11 = vperm.slane %v1337_v20, 1 }
 0x3eb   :  { %3144 = vrsqrt.f32 %v3827_v26  ;;  %vm1372_vm11 = vweird.f32 %v3827_v26  ;;  %1889 = vmatpush.bf16.msra.mxu2 %v2732_v42 }
 0x3ed   :  { %1861 = vmatpush.bf16.msrb.mxu0 %v2620_v45 }
 0x3f1   :  { %v3145_v44 = vpop.eup %3144  ;;  %1862 = vmatpush.bf16.msrb.mxu0 %v2612_v60 }
 0x3f2   :  { %v1367_v51 = vmul.f32 %v3145_v44, %v3827_v26  ;;  %vm1373_vm10 = vweird.f32 %v3145_v44 }
 0x3f3   :  { %vm1374_vm12 = vmor %vm1372_vm11, %vm1373_vm10 }
 0x3f4   :  { %v1368_v59 = vmul.f32 %v3145_v44, %v1367_v51 }
 0x3f5   :  { %1863 = vmatpush.bf16.msrb.mxu0 %v2604_v18  ;;  %v3588_v18 = vmov 256.0  }
 0x3f6   :  { %v1369_v5 = vmul.f32 0.5, %v1368_v59 }
 0x3f8   :  { %v1370_v13 = vsub.f32 1.5, %v1369_v5 }
 0x3fa   :  { %v1371_v22 = vmul.f32 %v3145_v44, %v1370_v13 }
 0x3fc   :  { %v1375_v28 = vsel %vm1374_vm12, %v3145_v44, %v1371_v22 }
 0x3fd   :  { %v1376_v29 = vmul.f32 %v1375_v28, %v3810_v14  ;;  %v1377_v30 = vmul.f32 %v1375_v28, %v3812_v15  ;;  %v1378_v33 = vmul.f32 %v1375_v28, %v3814_v16  ;;  %v1379_v26 = vmul.f32 %v1375_v28, %v3816_v17 }
 0x3ff   :  { %v1389_v35 = vmul.f32 %v1381_v24, %v1376_v29  ;;  %v1390_v36 = vmul.f32 %v1382_v25, %v1377_v30  ;;  %v1391_v37 = vmul.f32 %v1383_v40, %v1378_v33  ;;  %v1392_v38 = vmul.f32 %v1384_v27, %v1379_v26  ;;  %v3108_v29 = vld [vmem:[#allocation25 + $0x78] sm:$0xff]  ;;  %v3099_v30 = vld [vmem:[#allocation25 + $0x30] sm:$0xff]  ;;  %v3098_v26 = vld [vmem:[#allocation25 + $0x28] sm:$0xff] }
 0x400   :  { %v3107_v33 = vld [vmem:[#allocation25 + $0x70] sm:$0xff] }
 0x401   :  { %v1402_v39 = vadd.f32 %v1394_v49, %v1389_v35  ;;  %v1403_v41 = vadd.f32 %v1395_v11, %v1390_v36  ;;  %v1404_v43 = vadd.f32 %v1396_v19, %v1391_v37  ;;  %v1405_v44 = vadd.f32 %v1397_v34, %v1392_v38  ;;  %v3100_v19 = vld [vmem:[#allocation25 + $0x38] sm:$0xff]  ;;  %v3106_v34 = vld [vmem:[#allocation25 + $0x68] sm:$0xff]  ;;  %v3097_v35 = vld [vmem:[#allocation25 + $0x20] sm:$0xff] }
 0x402   :  { %v3105_v36 = vld [vmem:[#allocation25 + $0x60] sm:$0xff]  ;;  %v3096_v37 = vld [vmem:[#allocation25 + $0x18] sm:$0xff] }
 0x403   :  { %3146 = vtanh.f32 %v1402_v39  ;;  %v3104_v38 = vld [vmem:[#allocation25 + $0x58] sm:$0xff]  ;;  %v3095_v39 = vld [vmem:[#allocation25 + $0x10] sm:$0xff] }
 0x404   :  { %3148 = vtanh.f32 %v1403_v41  ;;  %v3103_v41 = vld [vmem:[#allocation25 + $0x50] sm:$0xff] }
 0x405   :  { %3150 = vtanh.f32 %v1404_v43  ;;  %v3094_v43 = vld [vmem:[#allocation25 + $0x8] sm:$0xff] }
 0x406   :  { %3152 = vtanh.f32 %v1405_v44  ;;  %v3102_v44 = vld [vmem:[#allocation25 + $0x48] sm:$0xff] }
 0x407   :  { %3154 = vrcp.f32 %v3588_v18 }
 0x409   :  { %v3147_v14 = vpop.eup %3146 }
 0x40a   :  { %v3149_v15 = vpop.eup %3148  ;;  %v1410_v16 = vpack.c.bf16 %v3147_v14, %v3147_v14 }
 0x40b   :  { %v3151_v17 = vpop.eup %3150  ;;  %v1411_v45 = vpack.c.bf16 %v3149_v15, %v3149_v15  ;;  %v3093_v15 = vld [vmem:[#allocation25] sm:$0xff] }
 0x40c   :  { %v3153_v46 = vpop.eup %3152  ;;  %1812 = vmatmul.bf16.vlgmr.msra.gmra.mxu0 %v1410_v16  ;;  %v1412_v47 = vpack.c.bf16 %v3151_v17, %v3151_v17 }
 0x40d   :  { %1825 = vmatmul.bf16.vlgmr.msra.gmra.mxu1 %v1411_v45  ;;  %v1413_v48 = vpack.c.bf16 %v3153_v46, %v3153_v46  ;;  %v3155_v32 = vpop.eup %3154  ;;  %2092 = vmatpush.bf16.msra.mxu0 %v3100_v19 }
 0x40e   :  { %1838 = vmatmul.bf16.vlgmr.msrb.gmra.mxu2 %v1412_v47  ;;  %v1914_v20 = vmul.f32 256.0, %v3155_v32  ;;  %vm1918_vm13 = vweird.f32 %v3155_v32  ;;  %2105 = vmatpush.bf16.msra.mxu1 %v3108_v29 }
 0x40f   :  { %1851 = vmatmul.bf16.vlgmr.msrb.gmra.mxu3 %v1413_v48 }
 0x410   :  { %v1915_v21 = vsub.f32 1.0, %v1914_v20 }
 0x411   :  { %2093 = vmatpush.bf16.msra.mxu0 %v3099_v30 }
 0x412   :  { %v1916_v22 = vmul.f32 %v3155_v32, %v1915_v21  ;;  %2106 = vmatpush.bf16.msra.mxu1 %v3107_v33 }
 0x414   :  { %v1917_v42 = vadd.f32 %v3155_v32, %v1916_v22 }
 0x415   :  { %2094 = vmatpush.bf16.msra.mxu0 %v3098_v26 }
 0x416   :  { %v1919_v23 = vsel %vm1918_vm13, %v3155_v32, %v1917_v42  ;;  %2107 = vmatpush.bf16.msra.mxu1 %v3106_v34 }
 0x419   :  { %2095 = vmatpush.bf16.msra.mxu0 %v3097_v35 }
 0x41a   :  { %2108 = vmatpush.bf16.msra.mxu1 %v3105_v36 }
 0x41c   :  { %1864 = vmatmul.bf16.vlgmr.msrb.gmra.mxu0 %v1410_v16  ;;  %v3101_v16 = vld [vmem:[#allocation25 + $0x40] sm:$0xff] }
 0x41d   :  { %1877 = vmatmul.bf16.vlgmr.msrb.gmra.mxu1 %v1411_v45  ;;  %2096 = vmatpush.bf16.msra.mxu0 %v3096_v37 }
 0x41e   :  { %1890 = vmatmul.bf16.vlgmr.msra.gmra.mxu2 %v1412_v47  ;;  %2109 = vmatpush.bf16.msra.mxu1 %v3104_v38 }
 0x41f   :  { %1903 = vmatmul.bf16.vlgmr.msra.gmra.mxu3 %v1413_v48 }
 0x421   :  { %2097 = vmatpush.bf16.msra.mxu0 %v3095_v39 }
 0x422   :  { %2110 = vmatpush.bf16.msra.mxu1 %v3103_v41 }
 0x425   :  { %2098 = vmatpush.bf16.msra.mxu0 %v3094_v43 }
 0x426   :  { %2111 = vmatpush.bf16.msra.mxu1 %v3102_v44 }
 0x429   :  { %2099 = vmatpush.bf16.msra.mxu0 %v3093_v15 }
 0x42a   :  { %2112 = vmatpush.bf16.msra.mxu1 %v3101_v16 }
 0x489   :  { %v1813_v50 = vpop.f32.mrf.mxu0 }
 0x48a   :  { %v1826_v51 = vpop.f32.mrf.mxu1  ;;  %v1814_v61 = vadd.f32 %v1813_v50, %v1480_v57 }
 0x48c   :  { %v1827_v1 = vadd.f32 %v1826_v51, %v1814_v61 }
 0x491   :  { %v1839_v52 = vpop.f32.mrf.mxu2  ;;  %v1815_v53 = vpop.f32.mrf.mxu0 }
 0x492   :  { %v1852_v54 = vpop.f32.mrf.mxu3  ;;  %v1828_v55 = vpop.f32.mrf.mxu1  ;;  %v1840_v2 = vadd.f32 %v1839_v52, %v1827_v1  ;;  %v1908_v52 = vld [vmem:[%s3871_s17] sm:$0x3] }
 0x493   :  { %v1943_v55 = vperm.slane %v1908_v52, 0  ;;  %v1944_v56 = vperm.slane %v1908_v52, 1 }
 0x494   :  { %v1853_v9 = vadd.f32 %v1852_v54, %v1840_v2  ;;  %v1909_v54 = vld [vmem:[#allocation23] sm:$0x3] }
 0x495   :  { %v1951_v61 = vperm.slane %v1909_v54, 1 }
 0x499   :  { %v1841_v59 = vpop.f32.mrf.mxu2  ;;  %v1865_v60 = vpop.f32.mrf.mxu0 }
 0x49a   :  { %v1854_v62 = vpop.f32.mrf.mxu3  ;;  %v1878_v63 = vpop.f32.mrf.mxu1  ;;  %v1866_v0 = vadd.f32 %v1865_v60, %v1481_v58  ;;  %v1950_v60 = vperm.slane %v1909_v54, 0 }
 0x49c   :  { %v1879_v3 = vadd.f32 %v1878_v63, %v1866_v0 }
 0x4a1   :  { %v1891_v4 = vpop.f32.mrf.mxu2  ;;  %v1867_v5 = vpop.f32.mrf.mxu0 }
 0x4a2   :  { %v1892_v6 = vadd.f32 %v1891_v4, %v1879_v3  ;;  %v1904_v7 = vpop.f32.mrf.mxu3  ;;  %v1880_v8 = vpop.f32.mrf.mxu1 }
 0x4a4   :  { %v1905_v10 = vadd.f32 %v1904_v7, %v1892_v6  ;;  %v3137_v6 = vld [vmem:[%s3890_s22] ss:$0 sm:$0xff] }
 0x4a6   :  { %v1910_v12 = vadd.f32 %v1905_v10, %v1853_v9 }
 0x4a8   :  { %1911 = vadd.xlane.f32.xlu0 %v1910_v12 }
 0x4a9   :  { %v1893_v13 = vpop.f32.mrf.mxu2 }
 0x4aa   :  { %v1906_v31 = vpop.f32.mrf.mxu3 }
 0x51b   :  { %v1912_v24 = vpop.xlane.xlu0 %1911 }
 0x51c   :  { %v1920_v25 = vmul.f32 %v1919_v23, %v1912_v24 }
 0x51e   :  { %v1921_v40 = vsub.f32 %v1853_v9, %v1920_v25  ;;  %v1922_v27 = vsub.f32 %v1905_v10, %v1920_v25 }
 0x520   :  { %v1923_v28 = vmul.f32 %v1921_v40, %v1921_v40  ;;  %v1924_v49 = vmul.f32 %v1922_v27, %v1922_v27 }
 0x522   :  { %v1925_v11 = vadd.f32 %v1924_v49, %v1923_v28 }
 0x524   :  { %1926 = vadd.xlane.f32.xlu1 %v1925_v11 }
 0x597   :  { %v1927_v14 = vpop.xlane.xlu1 %1926 }
 0x598   :  { %v1928_v17 = vmul.f32 %v1927_v14, %v1919_v23 }
 0x59a   :  { %v1929_v45 = vadd.f32 1e-05, %v1928_v17 }
 0x59c   :  { %3156 = vrsqrt.f32 %v1929_v45  ;;  %vm1936_vm15 = vweird.f32 %v1929_v45 }
 0x5a2   :  { %v3157_v46 = vpop.eup %3156 }
 0x5a3   :  { %v1931_v47 = vmul.f32 %v3157_v46, %v1929_v45  ;;  %vm1937_vm14 = vweird.f32 %v3157_v46 }
 0x5a4   :  { %vm1938_vm0 = vmor %vm1936_vm15, %vm1937_vm14 }
 0x5a5   :  { %v1932_v48 = vmul.f32 %v3157_v46, %v1931_v47 }
 0x5a7   :  { %v1933_v50 = vmul.f32 0.5, %v1932_v48 }
 0x5a9   :  { %v1934_v51 = vsub.f32 1.5, %v1933_v50 }
 0x5ab   :  { %v1935_v53 = vmul.f32 %v3157_v46, %v1934_v51 }
 0x5ad   :  { %v1939_v57 = vsel %vm1938_vm0, %v3157_v46, %v1935_v53 }
 0x5ae   :  { %v1940_v58 = vmul.f32 %v1939_v57, %v1921_v40  ;;  %v1941_v59 = vmul.f32 %v1939_v57, %v1922_v27 }
 0x5b0   :  { %v1947_v62 = vmul.f32 %v1943_v55, %v1940_v58  ;;  %v1948_v63 = vmul.f32 %v1944_v56, %v1941_v59 }
 0x5b2   :  { %v1954_v0 = vadd.f32 %v1950_v60, %v1947_v62  ;;  %v1955_v1 = vadd.f32 %v1951_v61, %v1948_v63 }
 0x5b4   :  { %3158 = vtanh.f32 %v1954_v0 }
 0x5b5   :  { %3160 = vtanh.f32 %v1955_v1 }
 0x5ba   :  { %v3159_v2 = vpop.eup %3158 }
 0x5bb   :  { %v3161_v3 = vpop.eup %3160  ;;  %v1958_v4 = vpack.c.bf16 %v3159_v2, %v3159_v2 }
 0x5bc   :  { %v1959_v5 = vpack.c.bf16 %v3161_v3, %v3161_v3 }
 0x5bd   :  { %2100 = vmatmul.bf16.vlgmr.msra.gmra.mxu0 %v1958_v4 }
 0x5be   :  { %2113 = vmatmul.bf16.vlgmr.msra.gmra.mxu1 %v1959_v5 }
 0x63a   :  { %v2101_v7 = vpop.f32.mrf.mxu0 }
 0x63b   :  { %v2102_v8 = vadd.f32 %v3137_v6, %v2101_v7  ;;  %v2114_v9 = vpop.f32.mrf.mxu1 }
 0x63d   :  { %v2115_v10 = vadd.f32 %v2114_v9, %v2102_v8 }
 0x63f   :  { %2118 = vst [vmem:[#allocation26] sm:$0xff] %v2115_v10 }
 0x640   :  { %2129 = dma.vmem_to_hbm [thread:$0]  %s2125_s7, 128, %s2127_s21, [#allocation4]  }
 0x642   :  { %v2103_v12 = vpop.f32.mrf.mxu0 }
 0x643   :  { %v2116_v13 = vpop.f32.mrf.mxu1 }
 0x644   :  { %3562 = dma.done.wait [#allocation4], 128  }
 0x645   :  { %3563 = vsyncadd [#allocation4], 4294967168 }
 0x646   :  { %2134 = vsyncpa [#allocation3], 1 }
 0x647   :  { %2135 = vsyncpa [#allocation6], 1 }
 0x648   :  { %2136 = vsyncpa [#allocation9], 1 }
 0x649   :  { %2137 = vsyncpa [#allocation12], 1 }
 0x64a   :  { %2138 = vsyncpa [#allocation15], 1 }
 0x64b   :  { %2139 = vsyncpa [#allocation18], 1 }
 0x64c   :  { %2140 = vsyncpa [#allocation21], 1 }
 0x64d   :  { %2141 = vsyncpa [#allocation24], 1 }
 0x64e   :  { %2142 = vsyncpa [#allocation4], 1 }

</bundles_post_ra>
